<compile_context>
chip_gen: v7x
topology: tpu7x:2x2x1
jax: 0.10.0
libtpu: 0.0.40
codegen_flags: <defaults>
</compile_context>

<pallas_src>
import functools
import math

import numpy as np
import jax
import jax.numpy as jnp
from jax.experimental import pallas as pl
from jax.experimental.pallas import tpu as pltpu


# -----------------------------------------------------------------------------
# constants reproducing the PyTorch module
# -----------------------------------------------------------------------------
_C_S = math.sin(math.pi / 8.0)
_C_X = math.cos(math.pi / 8.0)
_IDX_RE = np.array([0, 2, 3, 4, 8, 9, 10, 11, 12])
_IDX_IM = np.array([1, 5, 6, 7, 13, 14, 15, 16, 17])


def _irrep2tens_real():
    """irrep2tens from the module (its imaginary part is zero)."""
    tr = 3.0 ** (-0.5)
    tw = 2.0 ** (-0.5)
    return np.array(
        [
            [tr, 0, 0, 0, tr, 0, 0, 0, tr],
            [0, 0, 0, 0, 0, tw, 0, -tw, 0],
            [0, 0, -tw, 0, 0, 0, tw, 0, 0],
            [0, tw, 0, -tw, 0, 0, 0, 0, 0],
            [0, 0, tw, 0, 0, 0, tw, 0, 0],
            [0, tw, 0, tw, 0, 0, 0, 0, 0],
            [-tw * tr, 0, 0, 0, 2 * tw * tr, 0, 0, 0, -tw * tr],
            [0, 0, 0, 0, 0, tw, 0, tw, 0],
            [-tw, 0, 0, 0, 0, 0, 0, 0, tw],
        ],
        dtype=np.float32,
    )


def _selection_projections():
    """P_re / P_im: (18, 9) matrices folding the re/im column select + irrep2tens."""
    T = _irrep2tens_real()
    S_re = np.zeros((18, 9), np.float32)
    S_im = np.zeros((18, 9), np.float32)
    S_re[_IDX_RE, np.arange(9)] = 1.0
    S_im[_IDX_IM, np.arange(9)] = 1.0
    return S_re @ T, S_im @ T


# -----------------------------------------------------------------------------
# Pallas kernel: graph-convolution + Hamiltonian head, gridded over edge tiles
# -----------------------------------------------------------------------------
def _ghc_kernel(
    # inputs ------------------------------------------------------------------
    node_input_ref,   # (N, D_in)                f32   resident
    node_attr_ref,    # (N, D_attr)              f32   resident
    node_deg_ref,     # (N, 1)                   f32   resident
    edge_src_ref,     # (TE, 1)                  i32   edge tile (sublane-major)
    edge_dst_ref,     # (1, TE)                  i32   edge tile (lane-major)
    edge_attr_ref,    # (TE, D_edge)             f32   edge tile
    edge_lemb_ref,    # (TE, n_basis)            f32   edge tile
    w_lim_ref,        # (D_attr*D_in, D_in+D_out) f32  fused linear_input|mask
    w_te_ref,         # (D_edge*D_in, D_mid)     f32
    w_r1_ref,         # (n_basis, radial_neurons) f32
    w_r2_ref,         # (radial_neurons, D_mid)  f32
    w_lo_ref,         # (D_attr*D_mid, D_out)    f32
    cx_ref,           # (1, D_out)               f32   1 - mask + c_x*mask
    p_cat_ref,        # (D_out, 18)              f32   [P_re | P_im]
    # outputs -----------------------------------------------------------------
    out_ref,          # (N, 18)                  f32   [re | im] per node
    # scratch -----------------------------------------------------------------
    node_feat_sc,     # (N, D_in)                f32
    node_mask_sc,     # (N, D_out)               f32
    acc_sc,           # (N, D_mid)               f32   scatter accumulator
    *,
    d_in,
):
    e = pl.program_id(0)
    n_nodes = node_input_ref.shape[0]

    def fold(feat, a):
        # feat:(R,K), a:(R,A)  ->  (R, A*K) with col a*K+k = a[:,a]*feat[:,k]
        # (VPU scales + lane concat -> one K=A*K MXU matmul downstream)
        parts = [feat * a[:, k:k + 1] for k in range(a.shape[1])]
        return jnp.concatenate(parts, axis=1)

    # ---- first grid step: node-side bilinears + accumulator init -------------
    @pl.when(e == 0)
    def _init():
        x = node_input_ref[...]
        attr = node_attr_ref[...]
        inv_sqrt_deg = jax.lax.rsqrt(node_deg_ref[...])      # EUP rsqrt
        lim = jnp.dot(fold(x, attr), w_lim_ref[...],
                      preferred_element_type=jnp.float32)    # (N, D_in+D_out)
        node_feat_sc[...] = lim[:, :d_in] * inv_sqrt_deg     # linear_input / sqrt(deg)
        node_mask_sc[...] = lim[:, d_in:]                    # linear_mask
        acc_sc[...] = jnp.zeros_like(acc_sc)

    # ---- per-edge-tile work ---------------------------------------------------
    eattr = edge_attr_ref[...]
    lemb = edge_lemb_ref[...]
    te = eattr.shape[0]

    # edge2weight: FullyConnectedNet([n_basis, radial_neurons, D_mid], silu)
    h = jnp.dot(lemb, w_r1_ref[...], preferred_element_type=jnp.float32)
    h = h * jax.nn.sigmoid(h)                                # silu
    edge_weight = jnp.dot(h, w_r2_ref[...],
                          preferred_element_type=jnp.float32)   # (TE, D_mid)

    # gather node_feat[edge_src] via one-hot matmul (MXU friendly)
    # TODO(synk): for large graphs replace with scalar-prefetch-driven DMA
    # row gather (pl.Element index_map) instead of the O(TE*N) one-hot.
    iota_lane = jax.lax.broadcasted_iota(jnp.int32, (te, n_nodes), 1)
    src_oh = (edge_src_ref[...] == iota_lane).astype(jnp.float32)   # (TE, N)
    gathered = jnp.dot(src_oh, node_feat_sc[...],
                       preferred_element_type=jnp.float32)          # (TE, D_in)

    # tensor_edge (dense bilinear stand-in) modulated by radial weights
    edge_feat = jnp.dot(fold(gathered, eattr), w_te_ref[...],
                        preferred_element_type=jnp.float32) * edge_weight

    # scatter-add to edge_dst: one-hot built ALREADY transposed (N, TE)
    # (iota over dim 0 vs lane-major edge_dst) -> plain jnp.dot, no relayout.
    # Padded edges carry edge_dst = -1 and never match -> contribute nothing.
    iota_sub = jax.lax.broadcasted_iota(jnp.int32, (n_nodes, te), 0)
    dst_oh_t = (edge_dst_ref[...] == iota_sub).astype(jnp.float32)  # (N, TE)
    acc_sc[...] += jnp.dot(dst_oh_t, edge_feat,
                           preferred_element_type=jnp.float32)      # (N, D_mid)

    # ---- last grid step: output bilinear + mixing + Hamiltonian projection ---
    @pl.when(e == pl.num_programs(0) - 1)
    def _finalize():
        attr = node_attr_ref[...]
        inv_sqrt_deg = jax.lax.rsqrt(node_deg_ref[...])
        nf2 = acc_sc[...] * inv_sqrt_deg
        node_out = jnp.dot(fold(nf2, attr), w_lo_ref[...],
                           preferred_element_type=jnp.float32)      # (N, D_out)
        # c_s * node_mask + (1 - mask + c_x * mask) * node_output
        node_out = _C_S * node_mask_sc[...] + cx_ref[...] * node_out
        # fused [P_re | P_im] projection; all N rows projected, the wrapper
        # drops the first `numb` rows (avoids a sublane-misaligned slice here).
        out_ref[...] = jnp.dot(node_out, p_cat_ref[...],
                               preferred_element_type=jnp.float32)  # (N, 18)


# -----------------------------------------------------------------------------
# wrapper
# -----------------------------------------------------------------------------
def graph_hamiltonian_convolution(params, node_input, node_attr, node_deg,
                                  edge_src, edge_dst, edge_attr,
                                  edge_length_embedded, numb, n,
                                  *, edge_tile=128):
    N, D_in = node_input.shape
    D_attr = node_attr.shape[1]
    E = edge_src.shape[0]
    D_edge = edge_attr.shape[1]
    n_basis = edge_length_embedded.shape[1]
    r_neurons = params["w_r1"].shape[1]
    D_mid = params["w_te"].shape[2]
    D_out = params["w_lm"].shape[2]
    nb_blocks = N - numb
    assert nb_blocks == n * numb * numb, "node count must be numb + n*numb^2"

    # ---- one-time weight prep (outside the kernel) ----------------------------
    # fused linear_input | linear_mask, flattened to 2-D for K=D_attr*D_in matmuls
    w_lim2 = jnp.concatenate([params["w_li"], params["w_lm"]],
                             axis=2).reshape(D_attr * D_in, D_in + D_out)
    w_te2 = params["w_te"].reshape(D_edge * D_in, D_mid)
    w_lo2 = params["w_lo"].reshape(D_attr * D_mid, D_out)
    cx_vec = (1.0 - params["mask"] + _C_X * params["mask"]).astype(jnp.float32)
    p_cat = jnp.concatenate([params["p_re"], params["p_im"]], axis=1)  # (D_out, 18)

    # ---- pad edges to a multiple of the edge tile ------------------------------
    num_tiles = int(pl.cdiv(E, edge_tile))
    e_pad = num_tiles * edge_tile
    pad = e_pad - E
    es = jnp.pad(edge_src.astype(jnp.int32), (0, pad),
                 constant_values=0).reshape(e_pad, 1)            # sublane-major
    ed = jnp.pad(edge_dst.astype(jnp.int32), (0, pad),
                 constant_values=-1).reshape(1, e_pad)           # lane-major
    ea = jnp.pad(edge_attr, ((0, pad), (0, 0)))
    el = jnp.pad(edge_length_embedded, ((0, pad), (0, 0)))

    resident2 = lambda: (lambda e: (0, 0))                      # full-array blocks

    grid_spec = pltpu.PrefetchScalarGridSpec(
        num_scalar_prefetch=0,
        grid=(num_tiles,),
        in_specs=[
            pl.BlockSpec((N, D_in), resident2()),
            pl.BlockSpec((N, D_attr), resident2()),
            pl.BlockSpec((N, 1), resident2()),
            pl.BlockSpec((edge_tile, 1), lambda e: (e, 0)),
            pl.BlockSpec((1, edge_tile), lambda e: (0, e)),
            pl.BlockSpec((edge_tile, D_edge), lambda e: (e, 0)),
            pl.BlockSpec((edge_tile, n_basis), lambda e: (e, 0)),
            pl.BlockSpec((D_attr * D_in, D_in + D_out), resident2()),
            pl.BlockSpec((D_edge * D_in, D_mid), resident2()),
            pl.BlockSpec((n_basis, r_neurons), resident2()),
            pl.BlockSpec((r_neurons, D_mid), resident2()),
            pl.BlockSpec((D_attr * D_mid, D_out), resident2()),
            pl.BlockSpec((1, D_out), resident2()),
            pl.BlockSpec((D_out, 18), resident2()),
        ],
        out_specs=pl.BlockSpec((N, 18), resident2()),
        scratch_shapes=[
            pltpu.VMEM((N, D_in), jnp.float32),    # node_feat (post deg-norm)
            pltpu.VMEM((N, D_out), jnp.float32),   # node_mask
            pltpu.VMEM((N, D_mid), jnp.float32),   # scatter accumulator
        ],
    )

    # TODO(synk): for graphs with many nodes, add a "parallel" node-tile grid
    # axis so v7x's two TensorCores both get work; at these sizes one TC suffices.
    out = pl.pallas_call(
        functools.partial(_ghc_kernel, d_in=D_in),
        out_shape=jax.ShapeDtypeStruct((N, 18), jnp.float32),
        grid_spec=grid_spec,
        compiler_params=pltpu.CompilerParams(
            dimension_semantics=("arbitrary",),      # edge axis is a reduction
            vmem_limit_bytes=32 * 1024 * 1024,
        ),
    )(node_input, node_attr, node_deg, es, ed, ea, el,
      w_lim2, w_te2, params["w_r1"], params["w_r2"], w_lo2, cx_vec, p_cat)

    # drop the first `numb` rows here (kernel-side slice would be sublane-misaligned)
    tail = out[numb:]                                            # (NB, 18)
    blocks = (tail[:, :9] + 1j * tail[:, 9:]).astype(jnp.complex64)
    # glue(): cat/chunk/transpose dance == block matrix assembly (plain JAX)
    blocks = blocks.reshape(n, numb, numb, 3, 3)
    Hs = blocks.transpose(0, 1, 3, 2, 4).reshape(n, 3 * numb, 3 * numb)
    return Hs


# -----------------------------------------------------------------------------
# pure-JAX reference (for correctness check)
# -----------------------------------------------------------------------------
def _reference(params, node_input, node_attr, node_deg, edge_src, edge_dst,
               edge_attr, edge_lemb, numb, n):
    def bilinear(x, a, w):
        return jnp.einsum("ni,na,aio->no", x, a, w)

    nif = bilinear(node_input, node_attr, params["w_li"])
    nf = nif / jnp.sqrt(node_deg)
    nm = bilinear(node_input, node_attr, params["w_lm"])
    ew = jax.nn.silu(edge_lemb @ params["w_r1"]) @ params["w_r2"]
    ef = bilinear(nf[edge_src], edge_attr, params["w_te"]) * ew
    scat = jnp.zeros((node_input.shape[0], ef.shape[1]),
                     jnp.float32).at[edge_dst].add(ef)
    nf2 = scat / jnp.sqrt(node_deg)
    no = bilinear(nf2, node_attr, params["w_lo"])
    cxv = 1.0 - params["mask"] + _C_X * params["mask"]
    no = _C_S * nm + cxv * no
    tail = no[numb:]
    re = tail @ params["p_re"]
    im = tail @ params["p_im"]
    blocks = (re + 1j * im).astype(jnp.complex64).reshape(n, numb, numb, 3, 3)
    return blocks.transpose(0, 1, 3, 2, 4).reshape(n, 3 * numb, 3 * numb)


# -----------------------------------------------------------------------------
# main
# -----------------------------------------------------------------------------
if __name__ == "__main__":
    # small, self-consistent shapes
    numb, n_shifts = 2, 4                      # atoms per cell, cell shifts
    N = numb + n_shifts * numb * numb          # 18 graph nodes
    E = 300                                    # edges (-> 3 edge tiles of 128)
    D_in, D_attr, D_edge, D_mid = 32, 4, 4, 32
    D_out = 18                                 # 2x0e + 2x1e + 2x2e -> 18 dims
    N_BASIS, RADIAL_NEURONS = 10, 16           # number_of_basis, radial_neurons

    key = jax.random.PRNGKey(0)
    ks = jax.random.split(key, 12)

    node_input = jax.random.normal(ks[0], (N, D_in), jnp.float32)
    node_attr = jax.random.normal(ks[1], (N, D_attr), jnp.float32)
    edge_src = jax.random.randint(ks[2], (E,), 0, N, jnp.int32)
    edge_dst = jax.random.randint(ks[3], (E,), 0, N, jnp.int32)
    edge_attr = jax.random.normal(ks[4], (E, D_edge), jnp.float32)
    edge_lemb = jax.random.normal(ks[5], (E, N_BASIS), jnp.float32)
    node_deg = (1.0 + jnp.zeros((N,), jnp.float32).at[edge_dst].add(1.0)
                ).reshape(N, 1)

    def w(k, shape, fan_in):
        return jax.random.normal(k, shape, jnp.float32) / np.sqrt(fan_in)

    p_re, p_im = _selection_projections()
    params = {
        "w_li": w(ks[6], (D_attr, D_in, D_in), D_attr * D_in),
        "w_lm": w(ks[7], (D_attr, D_in, D_out), D_attr * D_in),
        "w_te": w(ks[8], (D_edge, D_in, D_mid), D_edge * D_in),
        "w_r1": w(ks[9], (N_BASIS, RADIAL_NEURONS), N_BASIS),
        "w_r2": w(ks[10], (RADIAL_NEURONS, D_mid), RADIAL_NEURONS),
        "w_lo": w(ks[11], (D_attr, D_mid, D_out), D_attr * D_mid),
        "mask": jnp.ones((1, D_out), jnp.float32),   # TODO(synk): e3nn output_mask
        "p_re": jnp.asarray(p_re),
        "p_im": jnp.asarray(p_im),
    }

    Hs = graph_hamiltonian_convolution(
        params, node_input, node_attr, node_deg, edge_src, edge_dst,
        edge_attr, edge_lemb, numb, n_shifts)
    Hs = jax.block_until_ready(Hs)

    Hs_ref = _reference(params, node_input, node_attr, node_deg, edge_src,
                        edge_dst, edge_attr, edge_lemb, numb, n_shifts)

    assert Hs.shape == (n_shifts, 3 * numb, 3 * numb), Hs.shape
    assert jnp.allclose(Hs.real, Hs_ref.real, atol=1e-3, rtol=1e-3)
    assert jnp.allclose(Hs.imag, Hs_ref.imag, atol=1e-3, rtol=1e-3)
    print("KERNEL_OK")
</pallas_src>

<mosaic_0001>
module attributes {stable_mosaic.version = 11 : i64} {
  func.func @_ghc_kernel(%arg0: i32, %arg1: memref<18x32xf32, #tpu.memory_space<vmem>>, %arg2: memref<18x4xf32, #tpu.memory_space<vmem>>, %arg3: memref<18x1xf32, #tpu.memory_space<vmem>>, %arg4: memref<128x1xi32, #tpu.memory_space<vmem>>, %arg5: memref<1x128xi32, #tpu.memory_space<vmem>>, %arg6: memref<128x4xf32, #tpu.memory_space<vmem>>, %arg7: memref<128x10xf32, #tpu.memory_space<vmem>>, %arg8: memref<128x50xf32, #tpu.memory_space<vmem>>, %arg9: memref<128x32xf32, #tpu.memory_space<vmem>>, %arg10: memref<10x16xf32, #tpu.memory_space<vmem>>, %arg11: memref<16x32xf32, #tpu.memory_space<vmem>>, %arg12: memref<128x18xf32, #tpu.memory_space<vmem>>, %arg13: memref<1x18xf32, #tpu.memory_space<vmem>>, %arg14: memref<18x18xf32, #tpu.memory_space<vmem>>, %arg15: memref<18x18xf32, #tpu.memory_space<vmem>>, %arg16: memref<18x32xf32, #tpu.memory_space<vmem>>, %arg17: memref<18x18xf32, #tpu.memory_space<vmem>>, %arg18: memref<18x32xf32, #tpu.memory_space<vmem>>) attributes {dimension_semantics = [#tpu.dimension_semantics<arbitrary>], iteration_bounds = array<i64: 3>, scalar_prefetch = 0 : i64, scratch_operands = 3 : i64, tpu.core_type = #tpu.core_type<tc>, window_params = [{pipeline_mode = #tpu.pipeline_mode<synchronous>, transform_indices = @transform_0, window_bounds = array<i64: 18, 32>}, {pipeline_mode = #tpu.pipeline_mode<synchronous>, transform_indices = @transform_1, window_bounds = array<i64: 18, 4>}, {pipeline_mode = #tpu.pipeline_mode<synchronous>, transform_indices = @transform_2, window_bounds = array<i64: 18, 1>}, {transform_indices = @transform_3, window_bounds = array<i64: 128, 1>}, {transform_indices = @transform_4, window_bounds = array<i64: 1, 128>}, {transform_indices = @transform_5, window_bounds = array<i64: 128, 4>}, {transform_indices = @transform_6, window_bounds = array<i64: 128, 10>}, {pipeline_mode = #tpu.pipeline_mode<synchronous>, transform_indices = @transform_7, window_bounds = array<i64: 128, 50>}, {pipeline_mode = #tpu.pipeline_mode<synchronous>, transform_indices = @transform_8, window_bounds = array<i64: 128, 32>}, {pipeline_mode = #tpu.pipeline_mode<synchronous>, transform_indices = @transform_9, window_bounds = array<i64: 10, 16>}, {pipeline_mode = #tpu.pipeline_mode<synchronous>, transform_indices = @transform_10, window_bounds = array<i64: 16, 32>}, {pipeline_mode = #tpu.pipeline_mode<synchronous>, transform_indices = @transform_11, window_bounds = array<i64: 128, 18>}, {pipeline_mode = #tpu.pipeline_mode<synchronous>, transform_indices = @transform_12, window_bounds = array<i64: 1, 18>}, {pipeline_mode = #tpu.pipeline_mode<synchronous>, transform_indices = @transform_13, window_bounds = array<i64: 18, 18>}, {pipeline_mode = #tpu.pipeline_mode<synchronous>, transform_indices = @transform_14, window_bounds = array<i64: 18, 18>}]} {
    %c0_i32 = arith.constant 0 : i32
    %0 = arith.cmpi eq, %arg0, %c0_i32 : i32
    %1 = arith.extui %0 : i1 to i32
    %c0_i32_0 = arith.constant 0 : i32
    %2 = arith.cmpi ne, %1, %c0_i32_0 : i32
    scf.if %2 {
      %c0_26 = arith.constant 0 : index
      %c0_27 = arith.constant 0 : index
      %52 = vector.load %arg1[%c0_26, %c0_27] : memref<18x32xf32, #tpu.memory_space<vmem>>, vector<18x32xf32>
      %c0_28 = arith.constant 0 : index
      %c0_29 = arith.constant 0 : index
      %53 = vector.load %arg2[%c0_28, %c0_29] : memref<18x4xf32, #tpu.memory_space<vmem>>, vector<18x4xf32>
      %c0_30 = arith.constant 0 : index
      %c0_31 = arith.constant 0 : index
      %54 = vector.load %arg3[%c0_30, %c0_31] : memref<18x1xf32, #tpu.memory_space<vmem>>, vector<18x1xf32>
      %55 = math.rsqrt %54 : vector<18x1xf32>
      %56 = vector.extract_strided_slice %53 {offsets = [0, 0], sizes = [18, 1], strides = [1, 1]} : vector<18x4xf32> to vector<18x1xf32>
      %57 = vector.broadcast %56 : vector<18x1xf32> to vector<18x32xf32>
      %58 = arith.mulf %52, %57 : vector<18x32xf32>
      %59 = vector.extract_strided_slice %53 {offsets = [0, 1], sizes = [18, 1], strides = [1, 1]} : vector<18x4xf32> to vector<18x1xf32>
      %60 = vector.broadcast %59 : vector<18x1xf32> to vector<18x32xf32>
      %61 = arith.mulf %52, %60 : vector<18x32xf32>
      %62 = vector.extract_strided_slice %53 {offsets = [0, 2], sizes = [18, 1], strides = [1, 1]} : vector<18x4xf32> to vector<18x1xf32>
      %63 = vector.broadcast %62 : vector<18x1xf32> to vector<18x32xf32>
      %64 = arith.mulf %52, %63 : vector<18x32xf32>
      %65 = vector.extract_strided_slice %53 {offsets = [0, 3], sizes = [18, 1], strides = [1, 1]} : vector<18x4xf32> to vector<18x1xf32>
      %66 = vector.broadcast %65 : vector<18x1xf32> to vector<18x32xf32>
      %67 = arith.mulf %52, %66 : vector<18x32xf32>
      %68 = tpu.concatenate %58, %61, %64, %67 in 1 : vector<18x32xf32>, vector<18x32xf32>, vector<18x32xf32>, vector<18x32xf32> -> vector<18x128xf32>
      %c0_32 = arith.constant 0 : index
      %c0_33 = arith.constant 0 : index
      %69 = vector.load %arg8[%c0_32, %c0_33] : memref<128x50xf32, #tpu.memory_space<vmem>>, vector<128x50xf32>
      %cst_34 = arith.constant dense<0.000000e+00> : vector<18x50xf32>
      %70 = tpu.matmul %68, %69, %cst_34 {dimension_numbers = #tpu.dot_dimension_numbers<[1], [0], [0], [1], [0, 0, 1, 1], [], []>} : vector<18x128xf32>, vector<128x50xf32>, vector<18x50xf32> -> vector<18x50xf32>
      %71 = vector.extract_strided_slice %70 {offsets = [0, 0], sizes = [18, 32], strides = [1, 1]} : vector<18x50xf32> to vector<18x32xf32>
      %72 = vector.broadcast %55 : vector<18x1xf32> to vector<18x32xf32>
      %73 = arith.mulf %71, %72 : vector<18x32xf32>
      %c0_35 = arith.constant 0 : index
      %c0_36 = arith.constant 0 : index
      %74 = vector.load %arg16[%c0_35, %c0_36] : memref<18x32xf32, #tpu.memory_space<vmem>>, vector<18x32xf32>
      tpu.vector_store %arg16[%c0_35, %c0_36], %73 {strides = array<i32>} : memref<18x32xf32, #tpu.memory_space<vmem>>, vector<18x32xf32>,
      %75 = vector.extract_strided_slice %70 {offsets = [0, 32], sizes = [18, 18], strides = [1, 1]} : vector<18x50xf32> to vector<18x18xf32>
      %c0_37 = arith.constant 0 : index
      %c0_38 = arith.constant 0 : index
      %76 = vector.load %arg17[%c0_37, %c0_38] : memref<18x18xf32, #tpu.memory_space<vmem>>, vector<18x18xf32>
      tpu.vector_store %arg17[%c0_37, %c0_38], %75 {strides = array<i32>} : memref<18x18xf32, #tpu.memory_space<vmem>>, vector<18x18xf32>,
      %cst_39 = arith.constant 0.000000e+00 : f32
      %77 = vector.broadcast %cst_39 : f32 to vector<18x32xf32>
      %c0_40 = arith.constant 0 : index
      %c0_41 = arith.constant 0 : index
      %78 = vector.load %arg18[%c0_40, %c0_41] : memref<18x32xf32, #tpu.memory_space<vmem>>, vector<18x32xf32>
      tpu.vector_store %arg18[%c0_40, %c0_41], %77 {strides = array<i32>} : memref<18x32xf32, #tpu.memory_space<vmem>>, vector<18x32xf32>,
    } else {
    }
    %c0 = arith.constant 0 : index
    %c0_1 = arith.constant 0 : index
    %3 = vector.load %arg6[%c0, %c0_1] : memref<128x4xf32, #tpu.memory_space<vmem>>, vector<128x4xf32>
    %c0_2 = arith.constant 0 : index
    %c0_3 = arith.constant 0 : index
    %4 = vector.load %arg7[%c0_2, %c0_3] : memref<128x10xf32, #tpu.memory_space<vmem>>, vector<128x10xf32>
    %c0_4 = arith.constant 0 : index
    %c0_5 = arith.constant 0 : index
    %5 = vector.load %arg10[%c0_4, %c0_5] : memref<10x16xf32, #tpu.memory_space<vmem>>, vector<10x16xf32>
    %cst = arith.constant dense<0.000000e+00> : vector<128x16xf32>
    %6 = tpu.matmul %4, %5, %cst {dimension_numbers = #tpu.dot_dimension_numbers<[1], [0], [0], [1], [0, 0, 1, 1], [], []>} : vector<128x10xf32>, vector<10x16xf32>, vector<128x16xf32> -> vector<128x16xf32>
    %7 = arith.negf %6 : vector<128x16xf32>
    %8 = math.exp %7 : vector<128x16xf32>
    %cst_6 = arith.constant 1.000000e+00 : f32
    %9 = vector.broadcast %cst_6 : f32 to vector<128x16xf32>
    %10 = arith.addf %9, %8 : vector<128x16xf32>
    %11 = arith.divf %9, %10 : vector<128x16xf32>
    %12 = arith.mulf %6, %11 : vector<128x16xf32>
    %c0_7 = arith.constant 0 : index
    %c0_8 = arith.constant 0 : index
    %13 = vector.load %arg11[%c0_7, %c0_8] : memref<16x32xf32, #tpu.memory_space<vmem>>, vector<16x32xf32>
    %cst_9 = arith.constant dense<0.000000e+00> : vector<128x32xf32>
    %14 = tpu.matmul %12, %13, %cst_9 {dimension_numbers = #tpu.dot_dimension_numbers<[1], [0], [0], [1], [0, 0, 1, 1], [], []>} : vector<128x16xf32>, vector<16x32xf32>, vector<128x32xf32> -> vector<128x32xf32>
    %15 = tpu.iota {dimensions = array<i32: 1>} : vector<128x18xi32>
    %c0_10 = arith.constant 0 : index
    %c0_11 = arith.constant 0 : index
    %16 = vector.load %arg4[%c0_10, %c0_11] : memref<128x1xi32, #tpu.memory_space<vmem>>, vector<128x1xi32>
    %17 = vector.broadcast %16 : vector<128x1xi32> to vector<128x18xi32>
    %18 = arith.cmpi eq, %17, %15 : vector<128x18xi32>
    %19 = arith.extui %18 : vector<128x18xi1> to vector<128x18xi32>
    %20 = arith.sitofp %19 : vector<128x18xi32> to vector<128x18xf32>
    %c0_12 = arith.constant 0 : index
    %c0_13 = arith.constant 0 : index
    %21 = vector.load %arg16[%c0_12, %c0_13] : memref<18x32xf32, #tpu.memory_space<vmem>>, vector<18x32xf32>
    %cst_14 = arith.constant dense<0.000000e+00> : vector<128x32xf32>
    %22 = tpu.matmul %20, %21, %cst_14 {dimension_numbers = #tpu.dot_dimension_numbers<[1], [0], [0], [1], [0, 0, 1, 1], [], []>} : vector<128x18xf32>, vector<18x32xf32>, vector<128x32xf32> -> vector<128x32xf32>
    %23 = vector.extract_strided_slice %3 {offsets = [0, 0], sizes = [128, 1], strides = [1, 1]} : vector<128x4xf32> to vector<128x1xf32>
    %24 = vector.broadcast %23 : vector<128x1xf32> to vector<128x32xf32>
    %25 = arith.mulf %22, %24 : vector<128x32xf32>
    %26 = vector.extract_strided_slice %3 {offsets = [0, 1], sizes = [128, 1], strides = [1, 1]} : vector<128x4xf32> to vector<128x1xf32>
    %27 = vector.broadcast %26 : vector<128x1xf32> to vector<128x32xf32>
    %28 = arith.mulf %22, %27 : vector<128x32xf32>
    %29 = vector.extract_strided_slice %3 {offsets = [0, 2], sizes = [128, 1], strides = [1, 1]} : vector<128x4xf32> to vector<128x1xf32>
    %30 = vector.broadcast %29 : vector<128x1xf32> to vector<128x32xf32>
    %31 = arith.mulf %22, %30 : vector<128x32xf32>
    %32 = vector.extract_strided_slice %3 {offsets = [0, 3], sizes = [128, 1], strides = [1, 1]} : vector<128x4xf32> to vector<128x1xf32>
    %33 = vector.broadcast %32 : vector<128x1xf32> to vector<128x32xf32>
    %34 = arith.mulf %22, %33 : vector<128x32xf32>
    %35 = tpu.concatenate %25, %28, %31, %34 in 1 : vector<128x32xf32>, vector<128x32xf32>, vector<128x32xf32>, vector<128x32xf32> -> vector<128x128xf32>
    %c0_15 = arith.constant 0 : index
    %c0_16 = arith.constant 0 : index
    %36 = vector.load %arg9[%c0_15, %c0_16] : memref<128x32xf32, #tpu.memory_space<vmem>>, vector<128x32xf32>
    %cst_17 = arith.constant dense<0.000000e+00> : vector<128x32xf32>
    %37 = tpu.matmul %35, %36, %cst_17 {dimension_numbers = #tpu.dot_dimension_numbers<[1], [0], [0], [1], [0, 0, 1, 1], [], []>} : vector<128x128xf32>, vector<128x32xf32>, vector<128x32xf32> -> vector<128x32xf32>
    %38 = arith.mulf %37, %14 : vector<128x32xf32>
    %39 = tpu.iota {dimensions = array<i32: 0>} : vector<18x128xi32>
    %c0_18 = arith.constant 0 : index
    %c0_19 = arith.constant 0 : index
    %40 = vector.load %arg5[%c0_18, %c0_19] : memref<1x128xi32, #tpu.memory_space<vmem>>, vector<1x128xi32>
    %41 = vector.broadcast %40 : vector<1x128xi32> to vector<18x128xi32>
    %42 = arith.cmpi eq, %41, %39 : vector<18x128xi32>
    %43 = arith.extui %42 : vector<18x128xi1> to vector<18x128xi32>
    %44 = arith.sitofp %43 : vector<18x128xi32> to vector<18x128xf32>
    %c0_20 = arith.constant 0 : index
    %c0_21 = arith.constant 0 : index
    %45 = vector.load %arg18[%c0_20, %c0_21] : memref<18x32xf32, #tpu.memory_space<vmem>>, vector<18x32xf32>
    %cst_22 = arith.constant dense<0.000000e+00> : vector<18x32xf32>
    %46 = tpu.matmul %44, %38, %cst_22 {dimension_numbers = #tpu.dot_dimension_numbers<[1], [0], [0], [1], [0, 0, 1, 1], [], []>} : vector<18x128xf32>, vector<128x32xf32>, vector<18x32xf32> -> vector<18x32xf32>
    %47 = arith.addf %45, %46 : vector<18x32xf32>
    %c0_23 = arith.constant 0 : index
    %c0_24 = arith.constant 0 : index
    %48 = vector.load %arg18[%c0_23, %c0_24] : memref<18x32xf32, #tpu.memory_space<vmem>>, vector<18x32xf32>
    tpu.vector_store %arg18[%c0_23, %c0_24], %47 {strides = array<i32>} : memref<18x32xf32, #tpu.memory_space<vmem>>, vector<18x32xf32>,
    %c2_i32 = arith.constant 2 : i32
    %49 = arith.cmpi eq, %arg0, %c2_i32 : i32
    %50 = arith.extui %49 : i1 to i32
    %c0_i32_25 = arith.constant 0 : i32
    %51 = arith.cmpi ne, %50, %c0_i32_25 : i32
    scf.if %51 {
      %c0_26 = arith.constant 0 : index
      %c0_27 = arith.constant 0 : index
      %52 = vector.load %arg2[%c0_26, %c0_27] : memref<18x4xf32, #tpu.memory_space<vmem>>, vector<18x4xf32>
      %c0_28 = arith.constant 0 : index
      %c0_29 = arith.constant 0 : index
      %53 = vector.load %arg3[%c0_28, %c0_29] : memref<18x1xf32, #tpu.memory_space<vmem>>, vector<18x1xf32>
      %54 = math.rsqrt %53 : vector<18x1xf32>
      %c0_30 = arith.constant 0 : index
      %c0_31 = arith.constant 0 : index
      %55 = vector.load %arg18[%c0_30, %c0_31] : memref<18x32xf32, #tpu.memory_space<vmem>>, vector<18x32xf32>
      %56 = vector.broadcast %54 : vector<18x1xf32> to vector<18x32xf32>
      %57 = arith.mulf %55, %56 : vector<18x32xf32>
      %58 = vector.extract_strided_slice %52 {offsets = [0, 0], sizes = [18, 1], strides = [1, 1]} : vector<18x4xf32> to vector<18x1xf32>
      %59 = vector.broadcast %58 : vector<18x1xf32> to vector<18x32xf32>
      %60 = arith.mulf %57, %59 : vector<18x32xf32>
      %61 = vector.extract_strided_slice %52 {offsets = [0, 1], sizes = [18, 1], strides = [1, 1]} : vector<18x4xf32> to vector<18x1xf32>
      %62 = vector.broadcast %61 : vector<18x1xf32> to vector<18x32xf32>
      %63 = arith.mulf %57, %62 : vector<18x32xf32>
      %64 = vector.extract_strided_slice %52 {offsets = [0, 2], sizes = [18, 1], strides = [1, 1]} : vector<18x4xf32> to vector<18x1xf32>
      %65 = vector.broadcast %64 : vector<18x1xf32> to vector<18x32xf32>
      %66 = arith.mulf %57, %65 : vector<18x32xf32>
      %67 = vector.extract_strided_slice %52 {offsets = [0, 3], sizes = [18, 1], strides = [1, 1]} : vector<18x4xf32> to vector<18x1xf32>
      %68 = vector.broadcast %67 : vector<18x1xf32> to vector<18x32xf32>
      %69 = arith.mulf %57, %68 : vector<18x32xf32>
      %70 = tpu.concatenate %60, %63, %66, %69 in 1 : vector<18x32xf32>, vector<18x32xf32>, vector<18x32xf32>, vector<18x32xf32> -> vector<18x128xf32>
      %c0_32 = arith.constant 0 : index
      %c0_33 = arith.constant 0 : index
      %71 = vector.load %arg12[%c0_32, %c0_33] : memref<128x18xf32, #tpu.memory_space<vmem>>, vector<128x18xf32>
      %cst_34 = arith.constant dense<0.000000e+00> : vector<18x18xf32>
      %72 = tpu.matmul %70, %71, %cst_34 {dimension_numbers = #tpu.dot_dimension_numbers<[1], [0], [0], [1], [0, 0, 1, 1], [], []>} : vector<18x128xf32>, vector<128x18xf32>, vector<18x18xf32> -> vector<18x18xf32>
      %c0_35 = arith.constant 0 : index
      %c0_36 = arith.constant 0 : index
      %73 = vector.load %arg17[%c0_35, %c0_36] : memref<18x18xf32, #tpu.memory_space<vmem>>, vector<18x18xf32>
      %cst_37 = arith.constant 0.382683426 : f32
      %74 = vector.broadcast %cst_37 : f32 to vector<18x18xf32>
      %75 = arith.mulf %74, %73 : vector<18x18xf32>
      %c0_38 = arith.constant 0 : index
      %c0_39 = arith.constant 0 : index
      %76 = vector.load %arg13[%c0_38, %c0_39] : memref<1x18xf32, #tpu.memory_space<vmem>>, vector<1x18xf32>
      %77 = vector.broadcast %76 : vector<1x18xf32> to vector<18x18xf32>
      %78 = arith.mulf %77, %72 : vector<18x18xf32>
      %79 = arith.addf %75, %78 : vector<18x18xf32>
      %c0_40 = arith.constant 0 : index
      %c0_41 = arith.constant 0 : index
      %80 = vector.load %arg14[%c0_40, %c0_41] : memref<18x18xf32, #tpu.memory_space<vmem>>, vector<18x18xf32>
      %cst_42 = arith.constant dense<0.000000e+00> : vector<18x18xf32>
      %81 = tpu.matmul %79, %80, %cst_42 {dimension_numbers = #tpu.dot_dimension_numbers<[1], [0], [0], [1], [0, 0, 1, 1], [], []>} : vector<18x18xf32>, vector<18x18xf32>, vector<18x18xf32> -> vector<18x18xf32>
      %c0_43 = arith.constant 0 : index
      %c0_44 = arith.constant 0 : index
      %82 = vector.load %arg15[%c0_43, %c0_44] : memref<18x18xf32, #tpu.memory_space<vmem>>, vector<18x18xf32>
      tpu.vector_store %arg15[%c0_43, %c0_44], %81 {strides = array<i32>} : memref<18x18xf32, #tpu.memory_space<vmem>>, vector<18x18xf32>,
    } else {
    }
    return
  }
  func.func @transform_0(%arg0: i32) -> (i32, i32) {
    %c0_i32 = arith.constant 0 : i32
    %c0_i32_0 = arith.constant 0 : i32
    %c0_i32_1 = arith.constant 0 : i32
    return %c0_i32, %c0_i32_0 : i32, i32
  }
  func.func @transform_1(%arg0: i32) -> (i32, i32) {
    %c0_i32 = arith.constant 0 : i32
    %c0_i32_0 = arith.constant 0 : i32
    %c0_i32_1 = arith.constant 0 : i32
    return %c0_i32, %c0_i32_0 : i32, i32
  }
  func.func @transform_2(%arg0: i32) -> (i32, i32) {
    %c0_i32 = arith.constant 0 : i32
    %c0_i32_0 = arith.constant 0 : i32
    %c0_i32_1 = arith.constant 0 : i32
    return %c0_i32, %c0_i32_0 : i32, i32
  }
  func.func @transform_3(%arg0: i32) -> (i32, i32) {
    %c0_i32 = arith.constant 0 : i32
    %c0_i32_0 = arith.constant 0 : i32
    return %arg0, %c0_i32 : i32, i32
  }
  func.func @transform_4(%arg0: i32) -> (i32, i32) {
    %c0_i32 = arith.constant 0 : i32
    %c0_i32_0 = arith.constant 0 : i32
    return %c0_i32, %arg0 : i32, i32
  }
  func.func @transform_5(%arg0: i32) -> (i32, i32) {
    %c0_i32 = arith.constant 0 : i32
    %c0_i32_0 = arith.constant 0 : i32
    return %arg0, %c0_i32 : i32, i32
  }
  func.func @transform_6(%arg0: i32) -> (i32, i32) {
    %c0_i32 = arith.constant 0 : i32
    %c0_i32_0 = arith.constant 0 : i32
    return %arg0, %c0_i32 : i32, i32
  }
  func.func @transform_7(%arg0: i32) -> (i32, i32) {
    %c0_i32 = arith.constant 0 : i32
    %c0_i32_0 = arith.constant 0 : i32
    %c0_i32_1 = arith.constant 0 : i32
    return %c0_i32, %c0_i32_0 : i32, i32
  }
  func.func @transform_8(%arg0: i32) -> (i32, i32) {
    %c0_i32 = arith.constant 0 : i32
    %c0_i32_0 = arith.constant 0 : i32
    %c0_i32_1 = arith.constant 0 : i32
    return %c0_i32, %c0_i32_0 : i32, i32
  }
  func.func @transform_9(%arg0: i32) -> (i32, i32) {
    %c0_i32 = arith.constant 0 : i32
    %c0_i32_0 = arith.constant 0 : i32
    %c0_i32_1 = arith.constant 0 : i32
    return %c0_i32, %c0_i32_0 : i32, i32
  }
  func.func @transform_10(%arg0: i32) -> (i32, i32) {
    %c0_i32 = arith.constant 0 : i32
    %c0_i32_0 = arith.constant 0 : i32
    %c0_i32_1 = arith.constant 0 : i32
    return %c0_i32, %c0_i32_0 : i32, i32
  }
  func.func @transform_11(%arg0: i32) -> (i32, i32) {
    %c0_i32 = arith.constant 0 : i32
    %c0_i32_0 = arith.constant 0 : i32
    %c0_i32_1 = arith.constant 0 : i32
    return %c0_i32, %c0_i32_0 : i32, i32
  }
  func.func @transform_12(%arg0: i32) -> (i32, i32) {
    %c0_i32 = arith.constant 0 : i32
    %c0_i32_0 = arith.constant 0 : i32
    %c0_i32_1 = arith.constant 0 : i32
    return %c0_i32, %c0_i32_0 : i32, i32
  }
  func.func @transform_13(%arg0: i32) -> (i32, i32) {
    %c0_i32 = arith.constant 0 : i32
    %c0_i32_0 = arith.constant 0 : i32
    %c0_i32_1 = arith.constant 0 : i32
    return %c0_i32, %c0_i32_0 : i32, i32
  }
  func.func @transform_14(%arg0: i32) -> (i32, i32) {
    %c0_i32 = arith.constant 0 : i32
    %c0_i32_0 = arith.constant 0 : i32
    %c0_i32_1 = arith.constant 0 : i32
    return %c0_i32, %c0_i32_0 : i32, i32
  }
}

</mosaic_0001>

<bundles_post_ra>
// kernel: tpu_custom_call.1
= control target key start
LH: loop header
LB: loop body
LE: loop exit
PB: predicated region body
PF: predicated region fallthrough
CT: control target
= control target key end

     0   :  { %19 = vsyncpa [#allocation6], 0  ;;  %s4084_s29 = smov 0   ;;  %s5085_s0 = inlined_call_operand.vmem [shape: f32[18,32], index: 0, kind: input, shape index: {}]   ;;  %s5086_s1 = inlined_call_operand.vmem [shape: f32[18,4], index: 1, kind: input, shape index: {}]   ;;  %s5087_s2 = inlined_call_operand.vmem [shape: f32[18,1], index: 2, kind: input, shape index: {}]   ;;  %s5088_s3 = inlined_call_operand.vmem [shape: s32[384,1], index: 3, kind: input, shape index: {}]   ;;  %s5089_s4 = inlined_call_operand.vmem [shape: s32[1,384], index: 4, kind: input, shape index: {}]   ;;  %s5090_s5 = inlined_call_operand.vmem [shape: f32[384,4], index: 5, kind: input, shape index: {}]   ;;  %s5091_s6 = inlined_call_operand.vmem [shape: f32[384,10], index: 6, kind: input, shape index: {}]   ;;  %s5092_s7 = inlined_call_operand.vmem [shape: f32[128,50], index: 7, kind: input, shape index: {}]   ;;  %s5093_s8 = inlined_call_operand.vmem [shape: f32[128,32], index: 8, kind: input, shape index: {}]   ;;  %s5094_s9 = inlined_call_operand.vmem [shape: f32[10,16], index: 9, kind: input, shape index: {}]   ;;  %s5095_s10 = inlined_call_operand.vmem [shape: f32[16,32], index: 10, kind: input, shape index: {}]   ;;  %s5096_s11 = inlined_call_operand.vmem [shape: f32[128,18], index: 11, kind: input, shape index: {}]   ;;  %s5097_s12 = inlined_call_operand.vmem [shape: f32[1,18], index: 12, kind: input, shape index: {}]   ;;  %s5098_s13 = inlined_call_operand.vmem [shape: f32[18,18], index: 13, kind: input, shape index: {}]   ;;  %s5099_s14 = inlined_call_operand.hbm [shape: f32[18,18], index: 14, kind: output, shape index: {}]  }
   0x1 LB: > { %5101 = sst [smem:[#allocation8_spill]] %s3972_s29  ;;  %s4090_s30 = sadd.s32 4294967295, %s3972_s29   ;;  %s3972_s29 = sphi %s4084_s29, %s25_s29  }
   0x2   : > { %p2937_p0 = scmp.ge.s32.totalorder %s3972_s29, 1  ;;  %p439_p1 = scmp.lt.s32.totalorder %s3972_s29, 4 }
   0x4   : > { %p440_p2 = pnand %p2937_p0, %p439_p1 }
   0x5   : > { %s2938_s15 = sshll.u32 (!%p440_p2), %s4090_s30, 4  ;;  %p499_p3 = scmp.lt.s32.totalorder (!%p440_p2), %s4090_s30, 2 }
   0x6   : > { %443 = sbr.rel (%p440_p2) target bundleno = 2170 (0x87a), region = 76  ;;  %p494_p4 = scmp.lt.s32.totalorder (!%p440_p2), %s2938_s15, 47 }
   0x7   : > { %p2944_p5 = scmp.ne.s32.totalorder (!%p440_p2), %s4090_s30, 0 }
   0xd   : > { %s4097_s16 = scalar_select %p499_p3, %s4090_s30, 2 }
   0xe   : > { %s5104_s15 = smov (!%p494_p4, %s2938_s15), 47  ;;  %517 = sbr.rel (%p2944_p5) target bundleno = 618 (0x26a), region = 80 }
   0xf   : > { %s501_s19 = scalar_lea.vmem %s5089_s4, %s4097_s16  ;;  %s2939_s20 = sshll.u32 %s5104_s15, 3  ;;  %v522_v0 = vld [vmem:[%s5086_s1 + $0x8] sm:$0xff] (!%p2944_p5)  ;;  %v3974_v1 = vmov (!%p2944_p5), 3   ;;  %v3975_v2 = vmov (!%p2944_p5), 1   ;;  %v521_v3 = vld [vmem:[%s5086_s1] sm:$0xff] (!%p2944_p5)  ;;  %v3976_v4 = vmov (!%p2944_p5), 2  }
  0x10   : > { %s4106_s23 = scalar_lea.vmem %s5088_s3, %s2939_s20  ;;  %s4111_s26 = scalar_lea.vmem %s5090_s5, %s2939_s20  ;;  %3664 = vset.pattern.permute.xlu1 (!%p2944_p5), %v3974_v1  ;;  %3662 = vset.pattern.permute.xlu0 (!%p2944_p5), %v3975_v2  ;;  %v523_v5 = vld [vmem:[%s5086_s1 + $0x10] sm:$0x3] (!%p2944_p5)  ;;  %v3977_v6 = vmov (!%p2944_p5), 0   ;;  %v641_v7 = vld [vmem:[%s5092_s7] sm:$0xff] (!%p2944_p5)  ;;  %v642_v8 = vld [vmem:[%s5092_s7 + $0x8] sm:$0xff] (!%p2944_p5)  ;;  %v3978_v10 = vmov (!%p2944_p5), 0.0|0.0  }
  0x11   : > { %s4116_s29 = scalar_lea.vmem %s5091_s6, %s2939_s20  ;;  %583 = vperm.xlu1 (!%p2944_p5), %3664, %v522_v0   ;;  %553 = vperm.xlu0 (!%p2944_p5), %3662, %v522_v0   ;;  %v643_v9 = vld [vmem:[%s5092_s7 + $0x10] sm:$0xff] (!%p2944_p5)  ;;  %v3475_v11 = vpack.c.bf16 (!%p2944_p5), %v642_v8, %v641_v7  ;;  %v644_v12 = vld [vmem:[%s5092_s7 + $0x18] sm:$0xff] (!%p2944_p5)  ;;  %v645_v14 = vld [vmem:[%s5092_s7 + $0x20] sm:$0xff] (!%p2944_p5)  ;;  %vm629_vm0 = vcmask (!%p2944_p5), 261120   ;;  %vm3979_vm1 = vmmov (!%p2944_p5), 0   ;;  %v3980_v34 = vmov (!%p2944_p5), 0.0  }
  0x12   : > { %3595 = vmatprep.subr.bf16.mxu1 (!%p2944_p5), %v3978_v10  ;;  %3474 = vmatprep.subr.bf16.mxu0 (!%p2944_p5), %v3978_v10  ;;  %v3478_v13 = vpack.c.bf16 (!%p2944_p5), %v644_v12, %v643_v9  ;;  %v646_v15 = vld [vmem:[%s5092_s7 + $0x28] sm:$0xff] (!%p2944_p5)  ;;  %v647_v17 = vld [vmem:[%s5092_s7 + $0x30] sm:$0xff] (!%p2944_p5)  ;;  %v648_v18 = vld [vmem:[%s5092_s7 + $0x38] sm:$0xff] (!%p2944_p5)  ;;  %776 = vst.msk [vmem:[#allocation4] sm:$0xff] (!%p2944_p5), %vm629_vm0, %v3980_v34  ;;  %s3981_s20 = smov (!%p2944_p5), 32   ;;  %s3982_s15 = smov (!%p2944_p5), 64  }
  0x13   : > { %3603 = vmatpush3.bf16.msra.mxu1 (!%p2944_p5), %v3475_v11  ;;  %3476 = vmatpush3.bf16.msra.mxu0 (!%p2944_p5), %v3475_v11  ;;  %v3481_v16 = vpack.c.bf16 (!%p2944_p5), %v646_v15, %v645_v14  ;;  %v3484_v19 = vpack.c.bf16 (!%p2944_p5), %v648_v18, %v647_v17  ;;  %v649_v20 = vld [vmem:[%s5092_s7 + $0x40] sm:$0xff] (!%p2944_p5)  ;;  %v650_v21 = vld [vmem:[%s5092_s7 + $0x48] sm:$0xff] (!%p2944_p5)  ;;  %v651_v23 = vld [vmem:[%s5092_s7 + $0x50] sm:$0xff] (!%p2944_p5)  ;;  %777 = vst.msk [vmem:[#allocation4 + $0x8] sm:$0xff] (!%p2944_p5), %vm629_vm0, %v3980_v34  ;;  %s3983_s18 = smov (!%p2944_p5), 96   ;;  %vm633_vm2 = vcmask (!%p2944_p5), 523264  }
  0x14   : > { %3596 = vmatprep.subr.bf16.mxu1 (!%p2944_p5), %v3978_v10  ;;  %3477 = vmatprep.subr.bf16.mxu0 (!%p2944_p5), %v3978_v10  ;;  %v3487_v22 = vpack.c.bf16 (!%p2944_p5), %v650_v21, %v649_v20  ;;  %v652_v24 = vld [vmem:[%s5092_s7 + $0x58] sm:$0xff] (!%p2944_p5)  ;;  %v653_v26 = vld [vmem:[%s5092_s7 + $0x60] sm:$0xff] (!%p2944_p5)  ;;  %v654_v27 = vld [vmem:[%s5092_s7 + $0x68] sm:$0xff] (!%p2944_p5)  ;;  %vm637_vm3 = vcmask (!%p2944_p5), 785408   ;;  %vm757_vm4 = vcmask (!%p2944_p5), 254976   ;;  %vm771_vm5 = vcmask (!%p2944_p5), 146432  }
  0x15   : > { %3665 = vset.pattern.permute.xlu1 %v3975_v2  ;;  %3663 = vset.pattern.permute.xlu0 %v3976_v4  ;;  %v3490_v25 = vpack.c.bf16 %v652_v24, %v651_v23  ;;  %v3493_v28 = vpack.c.bf16 %v654_v27, %v653_v26  ;;  %v655_v29 = vld [vmem:[%s5092_s7 + $0x70] sm:$0xff]  ;;  %v656_v30 = vld [vmem:[%s5092_s7 + $0x78] sm:$0xff]  ;;  %v4185_v35 = vld [vmem:[%s5085_s0] sm:$0xff]  ;;  %778 = vst.msk [vmem:[#allocation4 + $0x10] sm:$0x3] %vm757_vm4, %v3980_v34  ;;  %vm774_vm6 = vcmask 140288  }
  0x16   : > { %568 = vperm.xlu0 %3663, %v522_v0   ;;  %549 = vperm.xlu1 %3665, %v521_v3   ;;  %v3496_v33 = vpack.c.bf16 %v656_v30, %v655_v29  ;;  %v519_v36 = vld [vmem:[%s5085_s0 + $0x8] sm:$0xff]  ;;  %v524_v41 = vld [vmem:[%s5087_s2] sm:$0xff]  ;;  %v526_v47 = vld [vmem:[%s5087_s2 + $0x10] sm:$0x3] }
  0x17   : > { %3604 = vmatpush3.bf16.msra.mxu1 %v3478_v13  ;;  %3479 = vmatpush3.bf16.msra.mxu0 %v3478_v13  ;;  %3686 = vrsqrt.f32 %v524_v41  ;;  %v525_v50 = vld [vmem:[%s5087_s2 + $0x8] sm:$0xff]  ;;  %v520_v51 = vld [vmem:[%s5085_s0 + $0x10] sm:$0x3] }
  0x18   : > { %3597 = vmatprep.subr.bf16.mxu1 %v3978_v10  ;;  %3480 = vmatprep.subr.bf16.mxu0 %v3978_v10  ;;  %3688 = vrsqrt.f32 %v526_v47 }
  0x19   : > { %3229 = vmatprep.mubr.msk.f32.mxu1 %vm3979_vm1, %v3980_v34  ;;  %3226 = vmatprep.mubr.msk.f32.mxu0 %vm3979_vm1, %v3980_v34  ;;  %3690 = vrsqrt.f32 %v525_v50 }
  0x1a   : > { %564 = vperm.xlu0 %3663, %v521_v3   ;;  %557 = vperm.xlu1 %3665, %v523_v5  }
  0x1b   : > { %3605 = vmatpush3.bf16.msra.mxu1 %v3481_v16  ;;  %3482 = vmatpush3.bf16.msra.mxu0 %v3481_v16 }
  0x1c   : > { %3598 = vmatprep.subr.bf16.mxu1 %v3978_v10  ;;  %3483 = vmatprep.subr.bf16.mxu0 %v3978_v10 }
  0x1e   : > { %3666 = vset.pattern.permute.xlu1 %v3976_v4  ;;  %3667 = vset.pattern.permute.xlu0 %v3974_v1 }
  0x1f   : > { %572 = vperm.xlu1 %3666, %v523_v5   ;;  %579 = vperm.xlu0 %3667, %v521_v3  }
  0x20   : > { %3606 = vmatpush3.bf16.msra.mxu1 %v3484_v19  ;;  %3485 = vmatpush3.bf16.msra.mxu0 %v3484_v19 }
  0x21   : > { %3599 = vmatprep.subr.bf16.mxu1 %v3978_v10  ;;  %3486 = vmatprep.subr.bf16.mxu0 %v3978_v10  ;;  %v3687_v57 = vpop.eup %3686 }
  0x22   : > { %v3689_v61 = vpop.eup %3688 }
  0x23   : > { %3668 = vset.pattern.permute.xlu1 %v3974_v1  ;;  %3670 = vset.pattern.permute.xlu0 %v3977_v6  ;;  %v3691_v62 = vpop.eup %3690 }
  0x24   : > { %587 = vperm.xlu1 %3668, %v523_v5   ;;  %532 = vperm.xlu0 %3670, %v521_v3  }
  0x25   : > { %3607 = vmatpush3.bf16.msra.mxu1 %v3487_v22  ;;  %3488 = vmatpush3.bf16.msra.mxu0 %v3487_v22 }
  0x26   : > { %3600 = vmatprep.subr.bf16.mxu1 %v3978_v10  ;;  %3489 = vmatprep.subr.bf16.mxu0 %v3978_v10 }
  0x28   : > { %3669 = vset.pattern.permute.xlu1 %v3977_v6 }
  0x29   : > { %537 = vperm.xlu1 %3669, %v522_v0   ;;  %3608 = vmatpush3.bf16.msra.mxu1 %v3490_v25 }
  0x2a   : > { %3491 = vmatpush3.bf16.msra.mxu0 %v3490_v25  ;;  %3601 = vmatprep.subr.bf16.mxu1 %v3978_v10 }
  0x2b   : > { %3492 = vmatprep.subr.bf16.mxu0 %v3978_v10 }
  0x2d   : > { %542 = vperm.xlu1 %3669, %v523_v5   ;;  %3609 = vmatpush3.bf16.msra.mxu1 %v3493_v28 }
  0x2e   : > { %3494 = vmatpush3.bf16.msra.mxu0 %v3493_v28  ;;  %3602 = vmatprep.subr.bf16.mxu1 %v3978_v10 }
  0x2f   : > { %3495 = vmatprep.subr.bf16.mxu0 %v3978_v10 }
  0x31   : > { %3610 = vmatpush3.bf16.msra.mxu1 %v3496_v33 }
  0x32   : > { %3497 = vmatpush3.bf16.msra.mxu0 %v3496_v33 }
  0x90   : > { %v584_v31 = vpop.permute.xlu1 %583  ;;  %v554_v32 = vpop.permute.xlu0 %553 }
  0x91   : > { %v561_v39 = vmul.f32 %v554_v32, %v519_v36  ;;  %v591_v48 = vmul.f32 %v584_v31, %v519_v36 }
  0x95   : > { %v569_v37 = vpop.permute.xlu0 %568  ;;  %v550_v38 = vpop.permute.xlu1 %549 }
  0x96   : > { %v560_v40 = vmul.f32 %v550_v38, %v4185_v35  ;;  %v576_v45 = vmul.f32 %v569_v37, %v519_v36 }
  0x98   : > { %v3671_v42 = vpack.i.bf16 %v560_v40, %v561_v39 }
  0x99   : > { %v565_v43 = vpop.permute.xlu0 %564  ;;  %v558_v44 = vpop.permute.xlu1 %557 }
  0x9a   : > { %v575_v46 = vmul.f32 %v565_v43, %v4185_v35  ;;  %3672 = vrot.lane.b32.xlu1 %v3671_v42, %s3981_s20  ;;  %v562_v55 = vmul.f32 %v558_v44, %v520_v51 }
  0x9c   : > { %v3676_v49 = vpack.i.bf16 %v575_v46, %v576_v45 }
  0x9e   : > { %v573_v52 = vpop.permute.xlu1 %572  ;;  %3677 = vrot.lane.b32.xlu0 %v3676_v49, %s3982_s15  ;;  %622 = vrot.lane.b32.xlu1 %v591_v48, %s3983_s18  ;;  %v580_v54 = vpop.permute.xlu0 %579 }
  0x9f   : > { %v577_v53 = vmul.f32 %v573_v52, %v520_v51  ;;  %v590_v56 = vmul.f32 %v580_v54, %v4185_v35 }
  0xa2   : > { %600 = vrot.lane.b32.xlu0 %v562_v55, %s3981_s20  ;;  %612 = vrot.lane.b32.xlu1 %v577_v53, %s3982_s15 }
  0xa3   : > { %v588_v58 = vpop.permute.xlu1 %587  ;;  %v533_v1 = vpop.permute.xlu0 %532 }
  0xa4   : > { %v592_v59 = vmul.f32 %v588_v58, %v520_v51  ;;  %v545_v13 = vmul.f32 %v533_v1, %v4185_v35 }
  0xa6   : > { %v3681_v60 = vpack.i.bf16 %v592_v59, %v590_v56  ;;  %739 = vperm.xlu1 %3669, %v3687_v57  }
  0xa8   : > { %3682 = vrot.lane.b32.xlu0 %v3681_v60, %s3983_s18  ;;  %v538_v63 = vpop.permute.xlu1 %537 }
  0xa9   : > { %v546_v3 = vmul.f32 %v538_v63, %v519_v36 }
  0xaa   : > { %749 = vperm.xlu1 %3669, %v3689_v61  }
  0xac   : > { %744 = vperm.xlu0 %3670, %v3691_v62   ;;  %v543_v0 = vpop.permute.xlu1 %542 }
  0xad   : > { %v547_v12 = vmul.f32 %v543_v0, %v520_v51 }
 0x10c   : > { %v3673_v2 = vpop.permute.xlu1 %3672 }
 0x10d   : > { %v3674_v4 = vunpack.i.l.bf16 %v3673_v2  ;;  %v3675_v14 = vunpack.i.h.bf16 %v3673_v2 }
 0x10f   : > { %v631_v7 = vsel %vm629_vm0, %v546_v3, %v3674_v4  ;;  %v630_v21 = vsel %vm629_vm0, %v545_v13, %v3675_v14 }
 0x110   : > { %v3678_v5 = vpop.permute.xlu0 %3677  ;;  %v623_v8 = vpop.permute.xlu1 %622 }
 0x111   : > { %v3679_v6 = vunpack.i.l.bf16 %v3678_v5  ;;  %v3680_v15 = vunpack.i.h.bf16 %v3678_v5 }
 0x113   : > { %v635_v9 = vsel %vm633_vm2, %v631_v7, %v3679_v6  ;;  %v634_v23 = vsel %vm633_vm2, %v630_v21, %v3680_v15 }
 0x114   : > { %v639_v10 = vsel %vm637_vm3, %v635_v9, %v623_v8  ;;  %v601_v11 = vpop.permute.xlu0 %600  ;;  %v613_v17 = vpop.permute.xlu1 %612 }
 0x115   : > { %3230 = vmatmul.mubr.f32.vlgmr.msra.gmra.mrb[0].mxu1 %v639_v10  ;;  %v632_v16 = vsel %vm629_vm0, %v547_v12, %v601_v11 }
 0x116   : > { %3232 = vmatprep.mubr.msk.f32.mxu1 %vm3979_vm1, %v3980_v34  ;;  %v636_v22 = vsel %vm633_vm2, %v632_v16, %v613_v17 }
 0x11a   : > { %v3683_v18 = vpop.permute.xlu0 %3682 }
 0x11b   : > { %v3685_v19 = vunpack.i.h.bf16 %v3683_v18  ;;  %v3684_v20 = vunpack.i.l.bf16 %v3683_v18 }
 0x11d   : > { %v638_v24 = vsel %vm637_vm3, %v634_v23, %v3684_v20  ;;  %v640_v25 = vsel %vm637_vm3, %v636_v22, %v3685_v19 }
 0x11e   : > { %3227 = vmatmul.mubr.f32.vlgmr.msra.gmra.mrb[0].mxu0 %v638_v24  ;;  %3233 = vmatmul.mubr.f32.gmra.mrb[2].mxu1 %v640_v25 }
 0x125   : > { %v740_v30 = vpop.permute.xlu1 %739 }
 0x129   : > { %v750_v31 = vpop.permute.xlu1 %749 }
 0x12b   : > { %v745_v26 = vpop.permute.xlu0 %744 }
 0x1e8   : > { %v728_v27 = vpop.f32.mrb[0].mxu1 }
 0x1e9   : > { %v753_v28 = vmul.f32 %v745_v26, %v728_v27  ;;  %764 = vrot.lane.b32.xlu1 %v728_v27, %s3983_s18  ;;  %v3231_v29 = vpop.f32.mrb[1].mxu1 }
 0x1eb   : > { %756 = vst.msk [vmem:[#allocation2 + $0x8] sm:$0xff] %vm629_vm0, %v753_v28 }
 0x1f1   : > { %v723_v32 = vpop.f32.mrb[0].mxu0  ;;  %v733_v33 = vpop.f32.mrb[2].mxu1 }
 0x1f2   : > { %v752_v35 = vmul.f32 %v740_v30, %v723_v32  ;;  %v754_v36 = vmul.f32 %v750_v31, %v733_v33  ;;  %v3234_v37 = vpop.f32.mrb[3].mxu1  ;;  %762 = vrot.lane.b32.xlu0 %v723_v32, %s3983_s18  ;;  %v3228_v38 = vpop.f32.mrb[1].mxu0 }
 0x1f4   : > { %755 = vst.msk [vmem:[#allocation2] sm:$0xff] %vm629_vm0, %v752_v35 }
 0x1f5   : > { %758 = vst.msk [vmem:[#allocation2 + $0x10] sm:$0x3] %vm757_vm4, %v754_v36 }
 0x1f6   : > { %766 = vrot.lane.b32.xlu0 %v733_v33, %s3983_s18 }
 0x25b   : > { %v765_v34 = vpop.permute.xlu1 %764 }
 0x25c   : > { %773 = vst.msk [vmem:[#allocation3 + $0x8] sm:$0xff] %vm771_vm5, %v765_v34 }
 0x264   : > { %v763_v39 = vpop.permute.xlu0 %762 }
 0x265   : > { %772 = vst.msk [vmem:[#allocation3] sm:$0xff] %vm771_vm5, %v763_v39 }
 0x268   : > { %v767_v40 = vpop.permute.xlu0 %766 }
 0x269   : > { %775 = vst.msk [vmem:[#allocation3 + $0x10] sm:$0x3] %vm774_vm6, %v767_v40 }
 0x26a PF: > { %v1323_v41 = vld [vmem:[%s4106_s23 + $0x10] sm:$0xff]  ;;  %v1321_v42 = vld [vmem:[%s4106_s23] sm:$0xff]  ;;  %v3984_v43 = vmov 0   ;;  %v1324_v44 = vld [vmem:[%s4106_s23 + $0x18] sm:$0xff]  ;;  %vm862_vm7 = vcmask 1041408   ;;  %vm813_vm8 = vcmask 80896   ;;  %v1319_v37 = vlaneseq }
 0x26b   : > { %3693 = vset.pattern.permute.xlu1 %v3984_v43  ;;  %3692 = vset.pattern.permute.xlu0 %v3984_v43  ;;  %v1322_v45 = vld [vmem:[%s4106_s23 + $0x8] sm:$0xff]  ;;  %v811_v46 = vld [vmem:[%s5094_s9] sm:$0xff]  ;;  %vm3985_vm9 = vmmov 1   ;;  %v1328_v52 = vld [vmem:[%s4106_s23 + $0x38] sm:$0xff]  ;;  %v3986_v15 = vmov 1   ;;  %v3987_v18 = vmov 2  }
 0x26c   : > { %1344 = vperm.xlu1 %3693, %v1323_v41   ;;  %1338 = vperm.xlu0 %3692, %v1321_v42   ;;  %v812_v47 = vld [vmem:[%s5094_s9 + $0x8] sm:$0x3]  ;;  %vm3499_vm10 = vmpackc.low %vm862_vm7, %vm3985_vm9  ;;  %v1325_v49 = vld [vmem:[%s4106_s23 + $0x20] sm:$0xff]  ;;  %v3988_v21 = vmov 3   ;;  %v4373_v38 = vand.u32 127, %v1319_v37  ;;  %vm1436_vm11 = vcmask 146432  }
 0x26d   : > { %v1326_v48 = vld [vmem:[%s4106_s23 + $0x28] sm:$0xff]  ;;  %v3498_v50 = vpack.c.bf16 %v812_v47, %v811_v46  ;;  %v795_v51 = vld [vmem:[%s4116_s29] sm:$0xff]  ;;  %v1327_v53 = vld [vmem:[%s4106_s23 + $0x30] sm:$0xff]  ;;  %v3989_v40 = vmov 0.0   ;;  %s3990_s20 = smov 32   ;;  %s3991_s22 = smov 64  }
 0x26e   : > { %3239 = vmatprep.mubr.msk.f32.mxu0 %vm813_vm8, %v795_v51  ;;  %v796_v54 = vld [vmem:[%s4116_s29 + $0x8] sm:$0xff]  ;;  %v1433_v55 = vld [vmem:[#allocation2] sm:$0xff]  ;;  %v797_v56 = vld [vmem:[%s4116_s29 + $0x10] sm:$0xff]  ;;  %s3992_s24 = smov 96   ;;  %p3034_p6 = scmp.ne.s32.totalorder %s4090_s30, 2 }
 0x26f   : > { %3500 = vmatprep.subr.msk.bf16.mxu0 %vm3499_vm10, %v3498_v50  ;;  %3611 = vmatprep.subr.msk.bf16.mxu1 %vm3499_vm10, %v3498_v50  ;;  %v1434_v57 = vld [vmem:[#allocation2 + $0x8] sm:$0xff]  ;;  %v1329_v60 = vld [vmem:[%s4106_s23 + $0x40] sm:$0xff]  ;;  %v798_v61 = vld [vmem:[%s4116_s29 + $0x18] sm:$0xff]  ;;  %s4004_s16 = smov (!%p3034_p6), 32  }
 0x270   : > { %1347 = vperm.xlu1 %3693, %v1324_v44   ;;  %1341 = vperm.xlu0 %3692, %v1322_v45   ;;  %v3508_v58 = vpack.c.bf16 %v1434_v57, %v1433_v55  ;;  %v1330_v59 = vld [vmem:[%s4106_s23 + $0x48] sm:$0xff]  ;;  %v1435_v62 = vld [vmem:[#allocation2 + $0x10] sm:$0x3]  ;;  %v799_v63 = vld [vmem:[%s4116_s29 + $0x20] sm:$0xff] }
 0x271   : > { %3503 = vmatpush3.bf16.msk.msra.mxu0 %vm3499_vm10, %v3498_v50  ;;  %3612 = vmatpush3.bf16.msk.msra.mxu1 %vm3499_vm10, %v3498_v50  ;;  %v1332_v0 = vld [vmem:[%s4106_s23 + $0x58] sm:$0xff]  ;;  %v1331_v1 = vld [vmem:[%s4106_s23 + $0x50] sm:$0xff]  ;;  %v800_v2 = vld [vmem:[%s4116_s29 + $0x28] sm:$0xff] }
 0x272   : > { %3509 = vmatprep.subr.bf16.mxu0 %v3508_v58  ;;  %v801_v3 = vld [vmem:[%s4116_s29 + $0x30] sm:$0xff]  ;;  %v1334_v4 = vld [vmem:[%s4106_s23 + $0x68] sm:$0xff]  ;;  %v1333_v5 = vld [vmem:[%s4106_s23 + $0x60] sm:$0xff] }
 0x273   : > { %v802_v6 = vld [vmem:[%s4116_s29 + $0x38] sm:$0xff]  ;;  %v803_v7 = vld [vmem:[%s4116_s29 + $0x40] sm:$0xff]  ;;  %v1335_v9 = vld [vmem:[%s4106_s23 + $0x70] sm:$0xff] }
 0x274   : > { %1353 = vperm.xlu1 %3693, %v1326_v48   ;;  %1350 = vperm.xlu0 %3692, %v1325_v49   ;;  %v1336_v8 = vld [vmem:[%s4106_s23 + $0x78] sm:$0xff]  ;;  %v804_v10 = vld [vmem:[%s4116_s29 + $0x48] sm:$0xff]  ;;  %v805_v11 = vld [vmem:[%s4116_s29 + $0x50] sm:$0xff]  ;;  %s4003_s23 = smov (!%p3034_p6), 64  }
 0x275   : > { %3240 = vmatmul.mubr.msk.f32.vlgmr.msra.gmra.mrb[0].mxu0 %vm813_vm8, %v796_v54  ;;  %v4278_v12 = vld [vmem:[%s4111_s26 + $0x8] sm:$0xff]  ;;  %v806_v13 = vld [vmem:[%s4116_s29 + $0x58] sm:$0xff]  ;;  %v807_v14 = vld [vmem:[%s4116_s29 + $0x60] sm:$0xff] }
 0x276   : > { %3242 = vmatprep.mubr.msk.f32.mxu0 %vm813_vm8, %v797_v56  ;;  %3511 = vmatpush3.bf16.msra.mxu0 %v3508_v58  ;;  %v4287_v16 = vld [vmem:[%s4111_s26] sm:$0xff]  ;;  %v808_v17 = vld [vmem:[%s4116_s29 + $0x68] sm:$0xff]  ;;  %v4295_v19 = vld [vmem:[%s4111_s26 + $0x10] sm:$0xff] }
 0x277   : > { %3295 = vmatprep.subr.msk.mxu0 %vm862_vm7, %v1435_v62  ;;  %v4301_v20 = vld [vmem:[%s4111_s26 + $0x20] sm:$0xff]  ;;  %v785_v22 = vld [vmem:[%s4111_s26 + $0x30] sm:$0xff]  ;;  %v810_v24 = vld [vmem:[%s4116_s29 + $0x78] sm:$0xff] }
 0x278   : > { %1359 = vperm.xlu1 %3693, %v1328_v52   ;;  %1356 = vperm.xlu0 %3692, %v1327_v53   ;;  %v809_v23 = vld [vmem:[%s4116_s29 + $0x70] sm:$0xff]  ;;  %v782_v25 = vld [vmem:[%s4111_s26 + $0x18] sm:$0xff]  ;;  %v4312_v26 = vld [vmem:[%s4111_s26 + $0x40] sm:$0xff] }
 0x279   : > { %3243 = vmatmul.mubr.msk.f32.gmra.mrb[2].mxu0 %vm813_vm8, %v798_v61  ;;  %3260 = vmatprep.mubr.msk.f32.mxu1 %vm813_vm8, %v809_v23  ;;  %v4319_v27 = vld [vmem:[%s4111_s26 + $0x50] sm:$0xff]  ;;  %v4323_v28 = vld [vmem:[%s4111_s26 + $0x60] sm:$0xff]  ;;  %v784_v30 = vld [vmem:[%s4111_s26 + $0x28] sm:$0xff] }
 0x27a   : > { %3245 = vmatprep.mubr.msk.f32.mxu0 %vm813_vm8, %v799_v63  ;;  %3296 = vmatpush3.msk.msra.mxu0 %vm862_vm7, %v1435_v62  ;;  %v4329_v29 = vld [vmem:[%s4111_s26 + $0x70] sm:$0xff]  ;;  %v4341_v31 = vld [vmem:[%s4111_s26 + $0x38] sm:$0xff]  ;;  %v788_v32 = vld [vmem:[%s4111_s26 + $0x48] sm:$0xff] }
 0x27b   : > { %3261 = vmatmul.mubr.msk.f32.vlgmr.msra.gmra.mrb[0].mxu1 %vm813_vm8, %v810_v24  ;;  %v4348_v33 = vld [vmem:[%s4111_s26 + $0x58] sm:$0xff]  ;;  %v4354_v35 = vld [vmem:[%s4111_s26 + $0x68] sm:$0xff]  ;;  %v1123_v63 = vld [vmem:[%s5095_s10] sm:$0xff] }
 0x27c   : > { %1365 = vperm.xlu1 %3693, %v1330_v59   ;;  %1362 = vperm.xlu0 %3692, %v1329_v60   ;;  %v4359_v36 = vld [vmem:[%s4111_s26 + $0x78] sm:$0xff] }
 0x27d   : > { %3246 = vmatmul.mubr.msk.f32.gmra.mrb[4].mxu0 %vm813_vm8, %v800_v2 }
 0x27e   : > { %3248 = vmatprep.mubr.msk.f32.mxu0 %vm813_vm8, %v801_v3 }
 0x280   : > { %1371 = vperm.xlu1 %3693, %v1332_v0   ;;  %1368 = vperm.xlu0 %3692, %v1331_v1   ;;  %v1124_v0 = vld [vmem:[%s5095_s10 + $0x8] sm:$0xff] }
 0x281   : > { %3249 = vmatmul.mubr.msk.f32.gmra.mrb[6].mxu0 %vm813_vm8, %v802_v6  ;;  %v3504_v1 = vpack.c.bf16 %v1124_v0, %v1123_v63 }
 0x282   : > { %3251 = vmatprep.mubr.msk.f32.mxu0 %vm813_vm8, %v803_v7 }
 0x283   : > { %3505 = vmatprep.subr.bf16.mxu1 %v3504_v1 }
 0x284   : > { %1377 = vperm.xlu1 %3693, %v1334_v4   ;;  %1374 = vperm.xlu0 %3692, %v1333_v5  }
 0x285   : > { %3252 = vmatmul.mubr.msk.f32.gmra.mrb[8].mxu0 %vm813_vm8, %v804_v10  ;;  %3507 = vmatpush3.bf16.msra.mxu1 %v3504_v1 }
 0x286   : > { %3254 = vmatprep.mubr.msk.f32.mxu0 %vm813_vm8, %v805_v11 }
 0x288   : > { %1383 = vperm.xlu1 %3693, %v1336_v8   ;;  %1380 = vperm.xlu0 %3692, %v1335_v9  }
 0x289   : > { %3255 = vmatmul.mubr.msk.f32.gmra.mrb[10].mxu0 %vm813_vm8, %v806_v13 }
 0x28a   : > { %3257 = vmatprep.mubr.msk.f32.mxu0 %vm813_vm8, %v807_v14 }
 0x28c   : > { %3695 = vset.pattern.permute.xlu1 %v3986_v15  ;;  %3694 = vset.pattern.permute.xlu0 %v3986_v15 }
 0x28d   : > { %1734 = vperm.xlu1 %3695, %v4278_v12   ;;  %1730 = vperm.xlu0 %3694, %v4287_v16  }
 0x28e   : > { %3258 = vmatmul.mubr.msk.f32.gmra.mrb[12].mxu0 %vm813_vm8, %v808_v17 }
 0x291   : > { %3696 = vset.pattern.permute.xlu1 %v3987_v18  ;;  %1738 = vperm.xlu0 %3694, %v4295_v19  }
 0x292   : > { %1810 = vperm.xlu1 %3696, %v4287_v16  }
 0x295   : > { %1746 = vperm.xlu0 %3694, %v4301_v20  }
 0x296   : > { %3697 = vset.pattern.permute.xlu1 %v3988_v21 }
 0x297   : > { %1890 = vperm.xlu1 %3697, %v4287_v16  }
 0x299   : > { %1754 = vperm.xlu0 %3694, %v785_v22  }
 0x29b   : > { %1894 = vperm.xlu1 %3697, %v4278_v12  }
 0x29d   : > { %1762 = vperm.xlu0 %3694, %v4312_v26  }
 0x29f   : > { %3698 = vset.pattern.permute.xlu1 %v3986_v15 }
 0x2a0   : > { %1742 = vperm.xlu1 %3698, %v782_v25  }
 0x2a1   : > { %1770 = vperm.xlu0 %3694, %v4319_v27  }
 0x2a4   : > { %3699 = vset.pattern.permute.xlu1 %v3987_v18 }
 0x2a5   : > { %1818 = vperm.xlu1 %3699, %v4295_v19   ;;  %1778 = vperm.xlu0 %3694, %v4323_v28  }
 0x2a9   : > { %3700 = vset.pattern.permute.xlu1 %v3988_v21  ;;  %1786 = vperm.xlu0 %3694, %v4329_v29  }
 0x2aa   : > { %1898 = vperm.xlu1 %3700, %v4295_v19  }
 0x2ad   : > { %3716 = vset.pattern.permute.xlu0 %v3987_v18 }
 0x2ae   : > { %1902 = vperm.xlu1 %3700, %v782_v25   ;;  %1814 = vperm.xlu0 %3716, %v4278_v12  }
 0x2b2   : > { %3701 = vset.pattern.permute.xlu1 %v3986_v15  ;;  %1822 = vperm.xlu0 %3716, %v782_v25  }
 0x2b3   : > { %1750 = vperm.xlu1 %3701, %v784_v30  }
 0x2b6   : > { %1830 = vperm.xlu0 %3716, %v784_v30  }
 0x2b7   : > { %3702 = vset.pattern.permute.xlu1 %v3987_v18 }
 0x2b8   : > { %1826 = vperm.xlu1 %3702, %v4301_v20  }
 0x2ba   : > { %1838 = vperm.xlu0 %3716, %v4341_v31  }
 0x2bc   : > { %3703 = vset.pattern.permute.xlu1 %v3988_v21 }
 0x2bd   : > { %1906 = vperm.xlu1 %3703, %v4301_v20  }
 0x2be   : > { %1846 = vperm.xlu0 %3716, %v788_v32  }
 0x2c1   : > { %1910 = vperm.xlu1 %3703, %v784_v30  }
 0x2c2   : > { %1854 = vperm.xlu0 %3716, %v4348_v33  }
 0x2c5   : > { %3704 = vset.pattern.permute.xlu1 %v3986_v15 }
 0x2c6   : > { %1758 = vperm.xlu1 %3704, %v4341_v31   ;;  %1862 = vperm.xlu0 %3716, %v4354_v35  }
 0x2ca   : > { %3705 = vset.pattern.permute.xlu1 %v3987_v18  ;;  %1870 = vperm.xlu0 %3716, %v4359_v36  }
 0x2cb   : > { %1834 = vperm.xlu1 %3705, %v785_v22  }
 0x2ce   : > { %3720 = vset.pattern.permute.xlu0 %v3984_v43 }
 0x2cf   : > { %3706 = vset.pattern.permute.xlu1 %v3988_v21  ;;  %1635 = vperm.xlu0 %3720, %v4287_v16  }
 0x2d0   : > { %1914 = vperm.xlu1 %3706, %v785_v22  }
 0x2d3   : > { %1650 = vperm.xlu0 %3720, %v782_v25  }
 0x2d4   : > { %1918 = vperm.xlu1 %3706, %v4341_v31  }
 0x2d7   : > { %1660 = vperm.xlu0 %3720, %v784_v30  }
 0x2d8   : > { %3707 = vset.pattern.permute.xlu1 %v3986_v15 }
 0x2d9   : > { %1766 = vperm.xlu1 %3707, %v788_v32  }
 0x2db   : > { %1665 = vperm.xlu0 %3720, %v785_v22  }
 0x2dd   : > { %3708 = vset.pattern.permute.xlu1 %v3987_v18 }
 0x2de   : > { %1842 = vperm.xlu1 %3708, %v4312_v26  }
 0x2df   : > { %1680 = vperm.xlu0 %3720, %v788_v32  }
 0x2e2   : > { %3709 = vset.pattern.permute.xlu1 %v3988_v21 }
 0x2e3   : > { %1922 = vperm.xlu1 %3709, %v4312_v26   ;;  %1685 = vperm.xlu0 %3720, %v4319_v27  }
 0x2e7   : > { %1926 = vperm.xlu1 %3709, %v788_v32   ;;  %1700 = vperm.xlu0 %3720, %v4354_v35  }
 0x2eb   : > { %v1345_v34 = vpop.permute.xlu1 %1344  ;;  %v1339_v39 = vpop.permute.xlu0 %1338  ;;  %3710 = vset.pattern.permute.xlu1 %v3986_v15  ;;  %1705 = vperm.xlu0 %3720, %v4329_v29  }
 0x2ec   : > { %vm1385_vm12 = vcmp.eq.s32.totalorder %v1339_v39, %v4373_v38  ;;  %1774 = vperm.xlu1 %3710, %v4348_v33   ;;  %vm1387_vm13 = vcmp.eq.s32.totalorder %v1345_v34, %v4373_v38 }
 0x2ed   : > { %v2994_v41 = vsel %vm1385_vm12, 1.0, %v3989_v40  ;;  %v2996_v45 = vsel %vm1387_vm13, 1.0, %v3989_v40 }
 0x2ee   : > { %3297 = vmatprep.mubr.msk.f32.mxu0 %vm1436_vm11, %v2994_v41 }
 0x2ef   : > { %v1348_v42 = vpop.permute.xlu1 %1347  ;;  %v1342_v44 = vpop.permute.xlu0 %1341  ;;  %3842 = vset.pattern.permute.xlu0 %v3988_v21 }
 0x2f0   : > { %vm1386_vm14 = vcmp.eq.s32.totalorder %v1342_v44, %v4373_v38  ;;  %3711 = vset.pattern.permute.xlu1 %v3987_v18  ;;  %vm1388_vm15 = vcmp.eq.s32.totalorder %v1348_v42, %v4373_v38 }
 0x2f1   : > { %v2995_v46 = vsel %vm1386_vm14, 1.0, %v3989_v40  ;;  %1850 = vperm.xlu1 %3711, %v4319_v27   ;;  %v2997_v49 = vsel %vm1388_vm15, 1.0, %v3989_v40  ;;  %vm1125_vm14 = vcmask 130048   ;;  %vm2161_vm15 = vcmask 261120  }
 0x2f2   : > { %3298 = vmatmul.mubr.msk.f32.vlgmr.msra.gmra.mrb[14].mxu0 %vm1436_vm11, %v2995_v46 }
 0x2f3   : > { %v1354_v47 = vpop.permute.xlu1 %1353  ;;  %v1351_v48 = vpop.permute.xlu0 %1350  ;;  %3300 = vmatprep.mubr.msk.f32.mxu0 %vm1436_vm11, %v2996_v45 }
 0x2f4   : > { %vm1389_vm0 = vcmp.eq.s32.totalorder %v1351_v48, %v4373_v38  ;;  %vm1390_vm1 = vcmp.eq.s32.totalorder %v1354_v47, %v4373_v38 }
 0x2f5   : > { %v2998_v50 = vsel %vm1389_vm0, 1.0, %v3989_v40  ;;  %3712 = vset.pattern.permute.xlu1 %v3988_v21  ;;  %v2999_v53 = vsel %vm1390_vm1, 1.0, %v3989_v40  ;;  %vm2178_vm0 = vcmask 523264   ;;  %vm2195_vm1 = vcmask 785408  }
 0x2f6   : > { %3301 = vmatmul.mubr.msk.f32.gmra.mrb[16].mxu0 %vm1436_vm11, %v2997_v49  ;;  %1930 = vperm.xlu1 %3712, %v4319_v27  }
 0x2f7   : > { %v1360_v51 = vpop.permute.xlu1 %1359  ;;  %v1357_v52 = vpop.permute.xlu0 %1356  ;;  %3303 = vmatprep.mubr.msk.f32.mxu0 %vm1436_vm11, %v2998_v50 }
 0x2f8   : > { %vm1391_vm2 = vcmp.eq.s32.totalorder %v1357_v52, %v4373_v38  ;;  %vm1392_vm3 = vcmp.eq.s32.totalorder %v1360_v51, %v4373_v38 }
 0x2f9   : > { %v3000_v54 = vsel %vm1391_vm2, 1.0, %v3989_v40  ;;  %v3001_v57 = vsel %vm1392_vm3, 1.0, %v3989_v40  ;;  %vm3994_vm2 = vmmov 0  }
 0x2fa   : > { %3304 = vmatmul.mubr.msk.f32.gmra.mrb[18].mxu0 %vm1436_vm11, %v2999_v53  ;;  %1934 = vperm.xlu1 %3712, %v4348_v33  }
 0x2fb   : > { %v1366_v55 = vpop.permute.xlu1 %1365  ;;  %v1363_v56 = vpop.permute.xlu0 %1362  ;;  %3306 = vmatprep.mubr.msk.f32.mxu0 %vm1436_vm11, %v3000_v54 }
 0x2fc   : > { %vm1393_vm4 = vcmp.eq.s32.totalorder %v1363_v56, %v4373_v38  ;;  %vm1394_vm5 = vcmp.eq.s32.totalorder %v1366_v55, %v4373_v38 }
 0x2fd   : > { %v3002_v58 = vsel %vm1393_vm4, 1.0, %v3989_v40  ;;  %v3003_v61 = vsel %vm1394_vm5, 1.0, %v3989_v40 }
 0x2fe   : > { %3307 = vmatmul.mubr.msk.f32.gmra.mrb[20].mxu0 %vm1436_vm11, %v3001_v57  ;;  %3713 = vset.pattern.permute.xlu1 %v3986_v15 }
 0x2ff   : > { %v1372_v59 = vpop.permute.xlu1 %1371  ;;  %v1369_v60 = vpop.permute.xlu0 %1368  ;;  %3309 = vmatprep.mubr.msk.f32.mxu0 %vm1436_vm11, %v3002_v58  ;;  %1782 = vperm.xlu1 %3713, %v4354_v35  }
 0x300   : > { %vm1395_vm6 = vcmp.eq.s32.totalorder %v1369_v60, %v4373_v38  ;;  %vm1396_vm8 = vcmp.eq.s32.totalorder %v1372_v59, %v4373_v38 }
 0x301   : > { %v3004_v62 = vsel %vm1395_vm6, 1.0, %v3989_v40  ;;  %v3005_v4 = vsel %vm1396_vm8, 1.0, %v3989_v40  ;;  %vm2495_vm6 = vcmask 254976   ;;  %vm4001_vm8 = vmmov (!%p3034_p6), 0  }
 0x302   : > { %3310 = vmatmul.mubr.msk.f32.gmra.mrb[22].mxu0 %vm1436_vm11, %v3003_v61 }
 0x303   : > { %v1378_v2 = vpop.permute.xlu1 %1377  ;;  %v1375_v3 = vpop.permute.xlu0 %1374  ;;  %3312 = vmatprep.mubr.msk.f32.mxu0 %vm1436_vm11, %v3004_v62  ;;  %3714 = vset.pattern.permute.xlu1 %v3987_v18 }
 0x304   : > { %vm1397_vm9 = vcmp.eq.s32.totalorder %v1375_v3, %v4373_v38  ;;  %1858 = vperm.xlu1 %3714, %v4323_v28   ;;  %vm1398_vm10 = vcmp.eq.s32.totalorder %v1378_v2, %v4373_v38 }
 0x305   : > { %v3006_v5 = vsel %vm1397_vm9, 1.0, %v3989_v40  ;;  %v3007_v8 = vsel %vm1398_vm10, 1.0, %v3989_v40 }
 0x306   : > { %3313 = vmatmul.mubr.msk.f32.gmra.mrb[24].mxu0 %vm1436_vm11, %v3005_v4 }
 0x307   : > { %v1384_v6 = vpop.permute.xlu1 %1383  ;;  %v1381_v7 = vpop.permute.xlu0 %1380  ;;  %3315 = vmatprep.mubr.msk.f32.mxu0 %vm1436_vm11, %v3006_v5 }
 0x308   : > { %vm1399_vm12 = vcmp.eq.s32.totalorder %v1381_v7, %v4373_v38  ;;  %3715 = vset.pattern.permute.xlu1 %v3988_v21  ;;  %vm1400_vm13 = vcmp.eq.s32.totalorder %v1384_v6, %v4373_v38 }
 0x309   : > { %v3008_v9 = vsel %vm1399_vm12, 1.0, %v3989_v40  ;;  %1938 = vperm.xlu1 %3715, %v4323_v28   ;;  %v3009_v10 = vsel %vm1400_vm13, 1.0, %v3989_v40 }
 0x30a   : > { %3316 = vmatmul.mubr.msk.f32.gmra.mrb[26].mxu0 %vm1436_vm11, %v3007_v8 }
 0x30b   : > { %3318 = vmatprep.mubr.msk.f32.mxu0 %vm1436_vm11, %v3008_v9 }
 0x30c   : > { %v4455_v11 = vpop.permute.xlu1 %1734 }
 0x30d   : > { %1942 = vperm.xlu1 %3715, %v4354_v35  }
 0x30e   : > { %3319 = vmatmul.mubr.msk.f32.gmra.mrb[28].mxu0 %vm1436_vm11, %v3009_v10 }
 0x30f   : > { %3409 = vmatprep.mubr.msk.f32.mxu0 %vm3994_vm2, %v3989_v40 }
 0x311   : > { %3717 = vset.pattern.permute.xlu1 %v3986_v15  ;;  %v4458_v13 = vpop.permute.xlu1 %1810 }
 0x312   : > { %1790 = vperm.xlu1 %3717, %v4359_v36  }
 0x316   : > { %3718 = vset.pattern.permute.xlu1 %v3987_v18  ;;  %v4462_v14 = vpop.permute.xlu1 %1890 }
 0x317   : > { %1866 = vperm.xlu1 %3718, %v4329_v29  }
 0x31a   : > { %v4465_v15 = vpop.permute.xlu1 %1894 }
 0x31b   : > { %3719 = vset.pattern.permute.xlu1 %v3988_v21 }
 0x31c   : > { %1946 = vperm.xlu1 %3719, %v4329_v29  }
 0x320   : > { %1950 = vperm.xlu1 %3719, %v4359_v36  }
 0x324   : > { %3721 = vset.pattern.permute.xlu1 %v3984_v43  ;;  %v4469_v43 = vpop.permute.xlu1 %1742 }
 0x325   : > { %1640 = vperm.xlu1 %3721, %v4278_v12  }
 0x328   : > { %v4472_v12 = vpop.permute.xlu1 %1818 }
 0x329   : > { %1645 = vperm.xlu1 %3721, %v4295_v19  }
 0x32c   : > { %v4474_v16 = vpop.permute.xlu1 %1898 }
 0x32d   : > { %1655 = vperm.xlu1 %3721, %v4301_v20  }
 0x330   : > { %v4484_v22 = vpop.permute.xlu1 %1902 }
 0x331   : > { %1670 = vperm.xlu1 %3721, %v4341_v31  }
 0x334   : > { %v4496_v30 = vpop.permute.xlu1 %1750 }
 0x335   : > { %1675 = vperm.xlu1 %3721, %v4312_v26  }
 0x338   : > { %v4506_v44 = vpop.permute.xlu1 %1826 }
 0x339   : > { %1690 = vperm.xlu1 %3721, %v4348_v33  }
 0x33c   : > { %v4518_v58 = vpop.permute.xlu1 %1906 }
 0x33d   : > { %1695 = vperm.xlu1 %3721, %v4323_v28  }
 0x340   : > { %v4528_v8 = vpop.permute.xlu1 %1910 }
 0x341   : > { %1710 = vperm.xlu1 %3721, %v4359_v36  }
 0x348   : > { %v4476_v17 = vpop.f32.mrb[0].mxu0 }
 0x349   : > { %v2963_v18 = vmul.f32 -1.442695, %v4476_v17  ;;  %v4479_v19 = vpop.f32.mrb[1].mxu0 }
 0x34a   : > { %v2962_v20 = vmul.f32 -1.442695, %v4479_v19 }
 0x34b   : > { %3843 = vpow2.f32 %v2963_v18 }
 0x34c   : > { %3845 = vpow2.f32 %v2962_v20  ;;  %v4482_v21 = vpop.f32.mrb[2].mxu0 }
 0x34d   : > { %v2965_v23 = vmul.f32 -1.442695, %v4482_v21  ;;  %v4487_v24 = vpop.f32.mrb[3].mxu0 }
 0x34e   : > { %v2964_v25 = vmul.f32 -1.442695, %v4487_v24 }
 0x34f   : > { %3847 = vpow2.f32 %v2965_v23 }
 0x350   : > { %3849 = vpow2.f32 %v2964_v25  ;;  %v4490_v26 = vpop.f32.mrb[4].mxu0 }
 0x351   : > { %v2967_v27 = vmul.f32 -1.442695, %v4490_v26  ;;  %v4493_v28 = vpop.f32.mrb[5].mxu0 }
 0x352   : > { %v2966_v29 = vmul.f32 -1.442695, %v4493_v28 }
 0x353   : > { %3851 = vpow2.f32 %v2967_v27 }
 0x354   : > { %3853 = vpow2.f32 %v2966_v29  ;;  %v4498_v31 = vpop.f32.mrb[6].mxu0 }
 0x355   : > { %v3844_v32 = vpop.eup %3843  ;;  %v2969_v33 = vmul.f32 -1.442695, %v4498_v31  ;;  %v4501_v35 = vpop.f32.mrb[7].mxu0 }
 0x356   : > { %v3846_v36 = vpop.eup %3845  ;;  %v1060_v38 = vadd.f32 1.0, %v3844_v32  ;;  %v2968_v34 = vmul.f32 -1.442695, %v4501_v35 }
 0x357   : > { %v1059_v39 = vadd.f32 1.0, %v3846_v36  ;;  %3855 = vpow2.f32 %v2969_v33  ;;  %v4535_v36 = vpop.permute.xlu1 %1758 }
 0x358   : > { %3857 = vrcp.f32 %v1060_v38  ;;  %v4504_v41 = vpop.f32.mrb[8].mxu0 }
 0x359   : > { %v3848_v42 = vpop.eup %3847  ;;  %3859 = vrcp.f32 %v1059_v39  ;;  %v2971_v45 = vmul.f32 -1.442695, %v4504_v41  ;;  %v4509_v46 = vpop.f32.mrb[9].mxu0 }
 0x35a   : > { %v3850_v47 = vpop.eup %3849  ;;  %v1062_v48 = vadd.f32 1.0, %v3848_v42  ;;  %3861 = vpow2.f32 %v2968_v34  ;;  %v2970_v49 = vmul.f32 -1.442695, %v4509_v46 }
 0x35b   : > { %v1061_v50 = vadd.f32 1.0, %v3850_v47  ;;  %3863 = vpow2.f32 %v2971_v45 }
 0x35c   : > { %3865 = vrcp.f32 %v1062_v48  ;;  %v4512_v51 = vpop.f32.mrb[10].mxu0 }
 0x35d   : > { %v3852_v52 = vpop.eup %3851  ;;  %3867 = vrcp.f32 %v1061_v50  ;;  %v2973_v53 = vmul.f32 -1.442695, %v4512_v51  ;;  %v4515_v54 = vpop.f32.mrb[11].mxu0 }
 0x35e   : > { %v3854_v55 = vpop.eup %3853  ;;  %v1064_v56 = vadd.f32 1.0, %v3852_v52  ;;  %3869 = vpow2.f32 %v2970_v49  ;;  %v2972_v57 = vmul.f32 -1.442695, %v4515_v54  ;;  %v4542_v49 = vpop.permute.xlu1 %1834 }
 0x35f   : > { %v1063_v59 = vadd.f32 1.0, %v3854_v55  ;;  %3871 = vpow2.f32 %v2973_v53  ;;  %v4547_v53 = vpop.f32.mrb[0].mxu1  ;;  %v2212_v55 = vld [vmem:[%s5093_s8] sm:$0xff] }
 0x360   : > { %3873 = vrcp.f32 %v1064_v56  ;;  %v2213_v56 = vld [vmem:[%s5093_s8 + $0x8] sm:$0xff] }
 0x361   : > { %v4520_v60 = vpop.f32.mrb[12].mxu0  ;;  %v3856_v61 = vpop.eup %3855  ;;  %3875 = vrcp.f32 %v1063_v59  ;;  %v2977_v59 = vmul.f32 -1.442695, %v4547_v53 }
 0x362   : > { %v2975_v62 = vmul.f32 -1.442695, %v4520_v60  ;;  %v4523_v63 = vpop.f32.mrb[13].mxu0  ;;  %v3858_v0 = vpop.eup %3857  ;;  %v1066_v1 = vadd.f32 1.0, %v3856_v61  ;;  %3877 = vpow2.f32 %v2972_v57 }
 0x363   : > { %v2974_v2 = vmul.f32 -1.442695, %v4523_v63  ;;  %v3860_v3 = vpop.eup %3859  ;;  %v1108_v4 = vmul.f32 %v3858_v0, %v4476_v17  ;;  %v4561_v61 = vpop.f32.mrb[1].mxu1  ;;  %v2215_v0 = vld [vmem:[%s5093_s8 + $0x18] sm:$0xff] }
 0x364   : > { %3879 = vpow2.f32 %v2975_v62  ;;  %v3862_v5 = vpop.eup %3861  ;;  %v1107_v6 = vmul.f32 %v3860_v3, %v4479_v19  ;;  %v3512_v62 = vpack.c.bf16 %v2213_v56, %v2212_v55  ;;  %v2976_v3 = vmul.f32 -1.442695, %v4561_v61 }
 0x365   : > { %3881 = vrcp.f32 %v1066_v1  ;;  %v3864_v7 = vpop.eup %3863  ;;  %v1065_v9 = vadd.f32 1.0, %v3862_v5  ;;  %v2217_v5 = vld [vmem:[%s5093_s8 + $0x28] sm:$0xff] }
 0x366   : > { %3883 = vpow2.f32 %v2974_v2  ;;  %v3866_v10 = vpop.eup %3865  ;;  %v1068_v18 = vadd.f32 1.0, %v3864_v7  ;;  %3267 = vmatprep.mubr.msk.f32.mxu1 %vm1125_vm14, %v1107_v6  ;;  %v4574_v6 = vpop.permute.xlu1 %1914  ;;  %3513 = vmatprep.subr.bf16.mxu1 %v3512_v62 }
 0x367   : > { %v3868_v20 = vpop.eup %3867  ;;  %v1110_v23 = vmul.f32 %v3866_v10, %v4482_v21  ;;  %3885 = vrcp.f32 %v1065_v9  ;;  %3268 = vmatmul.mubr.msk.f32.vlgmr.msra.gmra.mrb[2].mxu1 %vm1125_vm14, %v1108_v4 }
 0x368   : > { %v3870_v17 = vpop.eup %3869  ;;  %v1109_v25 = vmul.f32 %v3868_v20, %v4487_v24  ;;  %3887 = vrcp.f32 %v1068_v18  ;;  %3515 = vmatpush3.bf16.msra.mxu1 %v3512_v62  ;;  %v2218_v20 = vld [vmem:[%s5093_s8 + $0x30] sm:$0xff] }
 0x369   : > { %v3872_v19 = vpop.eup %3871  ;;  %v1067_v27 = vadd.f32 1.0, %v3870_v17 }
 0x36a   : > { %v3874_v29 = vpop.eup %3873  ;;  %v1070_v32 = vadd.f32 1.0, %v3872_v19  ;;  %3270 = vmatprep.mubr.msk.f32.mxu1 %vm1125_vm14, %v1109_v25 }
 0x36b   : > { %v3876_v33 = vpop.eup %3875  ;;  %v1112_v38 = vmul.f32 %v3874_v29, %v4490_v26  ;;  %3889 = vrcp.f32 %v1067_v27  ;;  %3271 = vmatmul.mubr.msk.f32.gmra.mrb[4].mxu1 %vm1125_vm14, %v1110_v23  ;;  %v2219_v23 = vld [vmem:[%s5093_s8 + $0x38] sm:$0xff]  ;;  %v2220_v27 = vld [vmem:[%s5093_s8 + $0x40] sm:$0xff]  ;;  %v2221_v29 = vld [vmem:[%s5093_s8 + $0x48] sm:$0xff] }
 0x36c   : > { %v3878_v21 = vpop.eup %3877  ;;  %v1111_v34 = vmul.f32 %v3876_v33, %v4493_v28  ;;  %3891 = vrcp.f32 %v1070_v32  ;;  %v1731_v33 = vpop.permute.xlu0 %1730 }
 0x36d   : > { %v1069_v39 = vadd.f32 1.0, %v3878_v21  ;;  %v2222_v21 = vld [vmem:[%s5093_s8 + $0x50] sm:$0xff] }
 0x36e   : > { %v3880_v24 = vpop.eup %3879  ;;  %3273 = vmatprep.mubr.msk.f32.mxu1 %vm1125_vm14, %v1111_v34  ;;  %v2223_v34 = vld [vmem:[%s5093_s8 + $0x58] sm:$0xff] }
 0x36f   : > { %v3882_v42 = vpop.eup %3881  ;;  %v1072_v45 = vadd.f32 1.0, %v3880_v24  ;;  %3893 = vrcp.f32 %v1069_v39  ;;  %3274 = vmatmul.mubr.msk.f32.gmra.mrb[6].mxu1 %vm1125_vm14, %v1112_v38 }
 0x370   : > { %v3884_v47 = vpop.eup %3883  ;;  %v1114_v50 = vmul.f32 %v3882_v42, %v4498_v31  ;;  %v2214_v31 = vld [vmem:[%s5093_s8 + $0x10] sm:$0xff]  ;;  %v3532_v42 = vpack.c.bf16 %v2223_v34, %v2222_v21 }
 0x371   : > { %3895 = vrcp.f32 %v1072_v45  ;;  %v1071_v48 = vadd.f32 1.0, %v3884_v47  ;;  %v3886_v26 = vpop.eup %3885  ;;  %v3516_v4 = vpack.c.bf16 %v2215_v0, %v2214_v31  ;;  %v1739_v45 = vpop.permute.xlu0 %1738 }
 0x372   : > { %v3888_v52 = vpop.eup %3887  ;;  %v1113_v28 = vmul.f32 %v3886_v26, %v4501_v35 }
 0x373   : > { %3897 = vrcp.f32 %v1071_v48  ;;  %v1116_v35 = vmul.f32 %v3888_v52, %v4504_v41  ;;  %v2216_v41 = vld [vmem:[%s5093_s8 + $0x20] sm:$0xff]  ;;  %3517 = vmatprep.subr.bf16.mxu1 %v3516_v4 }
 0x374   : > { %3276 = vmatprep.mubr.msk.f32.mxu1 %vm1125_vm14, %v1113_v28  ;;  %3899 = vpow2.f32 %v2977_v59  ;;  %v3520_v9 = vpack.c.bf16 %v2217_v5, %v2216_v41  ;;  %3519 = vmatpush3.bf16.msra.mxu1 %v3516_v4  ;;  %v2224_v41 = vld [vmem:[%s5093_s8 + $0x60] sm:$0xff]  ;;  %v2225_v5 = vld [vmem:[%s5093_s8 + $0x68] sm:$0xff] }
 0x375   : > { %v3890_v57 = vpop.eup %3889  ;;  %3277 = vmatmul.mubr.msk.f32.gmra.mrb[8].mxu1 %vm1125_vm14, %v1114_v50  ;;  %3901 = vpow2.f32 %v2976_v3  ;;  %v4610_v26 = vpop.permute.xlu0 %1746 }
 0x376   : > { %v3892_v1 = vpop.eup %3891  ;;  %v1115_v2 = vmul.f32 %v3890_v57, %v4509_v46  ;;  %3521 = vmatprep.subr.bf16.mxu1 %v3520_v9 }
 0x377   : > { %v1118_v7 = vmul.f32 %v3892_v1, %v4512_v51  ;;  %v4587_v51 = vpop.permute.xlu1 %1918 }
 0x378   : > { %3279 = vmatprep.mubr.msk.f32.mxu1 %vm1125_vm14, %v1115_v2  ;;  %3523 = vmatpush3.bf16.msra.mxu1 %v3520_v9  ;;  %v2226_v9 = vld [vmem:[%s5093_s8 + $0x70] sm:$0xff] }
 0x379   : > { %v3894_v46 = vpop.eup %3893  ;;  %3280 = vmatmul.mubr.msk.f32.gmra.mrb[10].mxu1 %vm1125_vm14, %v1116_v35  ;;  %v4618_v56 = vpop.permute.xlu0 %1754 }
 0x37a   : > { %v1117_v18 = vmul.f32 %v3894_v46, %v4515_v54  ;;  %v3524_v54 = vpack.c.bf16 %v2219_v23, %v2218_v20 }
 0x37b   : > { %v3896_v10 = vpop.eup %3895  ;;  %v4606_v24 = vpop.permute.xlu1 %1766 }
 0x37c   : > { %3282 = vmatprep.mubr.msk.f32.mxu1 %vm1125_vm14, %v1117_v18  ;;  %v1120_v25 = vmul.f32 %v3896_v10, %v4520_v60  ;;  %3525 = vmatprep.subr.bf16.mxu1 %v3524_v54  ;;  %v3528_v60 = vpack.c.bf16 %v2221_v29, %v2220_v27  ;;  %v2227_v10 = vld [vmem:[%s5093_s8 + $0x78] sm:$0xff] }
 0x37d   : > { %v3898_v17 = vpop.eup %3897  ;;  %3283 = vmatmul.mubr.msk.f32.gmra.mrb[12].mxu1 %vm1125_vm14, %v1118_v7  ;;  %v4622_v57 = vpop.permute.xlu0 %1762  ;;  %v3536_v7 = vpack.c.bf16 %v2225_v5, %v2224_v41  ;;  %v3540_v18 = vpack.c.bf16 %v2227_v10, %v2226_v9 }
 0x37e   : > { %v1119_v19 = vmul.f32 %v3898_v17, %v4523_v63  ;;  %v3900_v32 = vpop.eup %3899  ;;  %3527 = vmatpush3.bf16.msra.mxu1 %v3524_v54 }
 0x37f   : > { %v3902_v63 = vpop.eup %3901  ;;  %v1074_v38 = vadd.f32 1.0, %v3900_v32  ;;  %3529 = vmatprep.subr.bf16.mxu1 %v3528_v60  ;;  %v4608_v47 = vpop.permute.xlu1 %1842 }
 0x380   : > { %3285 = vmatprep.mubr.msk.f32.mxu1 %vm1125_vm14, %v1119_v19  ;;  %v1073_v39 = vadd.f32 1.0, %v3902_v63 }
 0x381   : > { %3286 = vmatmul.mubr.msk.f32.gmra.mrb[14].mxu1 %vm1125_vm14, %v1120_v25  ;;  %3903 = vrcp.f32 %v1074_v38  ;;  %v4626_v59 = vpop.permute.xlu0 %1770 }
 0x382   : > { %3905 = vrcp.f32 %v1073_v39  ;;  %3531 = vmatpush3.bf16.msra.mxu1 %v3528_v60 }
 0x383   : > { %3533 = vmatprep.subr.bf16.mxu1 %v3532_v42  ;;  %v4612_v52 = vpop.permute.xlu1 %1922 }
 0x385   : > { %v4630_v0 = vpop.permute.xlu0 %1778 }
 0x386   : > { %3535 = vmatpush3.bf16.msra.mxu1 %v3532_v42 }
 0x387   : > { %v4620_v31 = vpop.permute.xlu1 %1926  ;;  %3537 = vmatprep.subr.bf16.mxu1 %v3536_v7 }
 0x38a   : > { %3539 = vmatpush3.bf16.msra.mxu1 %v3536_v7 }
 0x38b   : > { %v3904_v48 = vpop.eup %3903  ;;  %v4624_v35 = vpop.permute.xlu1 %1774  ;;  %3541 = vmatprep.subr.bf16.mxu1 %v3540_v18 }
 0x38c   : > { %v3906_v50 = vpop.eup %3905  ;;  %v1122_v28 = vmul.f32 %v3904_v48, %v4547_v53 }
 0x38d   : > { %v1121_v55 = vmul.f32 %v3906_v50, %v4561_v61  ;;  %v4634_v61 = vpop.permute.xlu0 %1786 }
 0x38e   : > { %3543 = vmatpush3.bf16.msra.mxu1 %v3540_v18 }
 0x38f   : > { %3288 = vmatprep.mubr.msk.f32.mxu1 %vm1125_vm14, %v1121_v55  ;;  %v4628_v62 = vpop.permute.xlu1 %1850 }
 0x390   : > { %3289 = vmatmul.mubr.msk.f32.gmra.mrb[16].mxu1 %vm1125_vm14, %v1122_v28 }
 0x391   : > { %v1815_v2 = vpop.permute.xlu0 %1814 }
 0x393   : > { %v4632_v53 = vpop.permute.xlu1 %1930 }
 0x395   : > { %v1823_v4 = vpop.permute.xlu0 %1822 }
 0x397   : > { %v4636_v1 = vpop.permute.xlu1 %1934 }
 0x399   : > { %v1831_v20 = vpop.permute.xlu0 %1830 }
 0x39b   : > { %v4638_v3 = vpop.permute.xlu1 %1782 }
 0x39d   : > { %v1839_v63 = vpop.permute.xlu0 %1838 }
 0x39f   : > { %v4646_v46 = vpop.permute.xlu1 %1858 }
 0x3a3   : > { %v4654_v23 = vpop.permute.xlu1 %1938 }
 0x3a7   : > { %v4670_v38 = vpop.permute.xlu1 %1942 }
 0x3ab   : > { %v4697_v41 = vpop.permute.xlu1 %1790 }
 0x3c5   : > { %v4656_v17 = vpop.f32.mrb[14].mxu0 }
 0x3c6   : > { %v1794_v25 = vmul.f32 %v4656_v17, %v4455_v11  ;;  %v1874_v19 = vmul.f32 %v4656_v17, %v1815_v2  ;;  %v1954_v54 = vmul.f32 %v4656_v17, %v4465_v15  ;;  %v4663_v27 = vpop.f32.mrb[15].mxu0  ;;  %v1847_v2 = vpop.permute.xlu0 %1846 }
 0x3c7   : > { %v1793_v29 = vmul.f32 %v1731_v33, %v4663_v27  ;;  %v1873_v32 = vmul.f32 %v4458_v13, %v4663_v27  ;;  %v1953_v60 = vmul.f32 %v4462_v14, %v4663_v27 }
 0x3c9   : > { %v4672_v21 = vpop.f32.mrb[16].mxu0  ;;  %v3722_v11 = vpack.i.bf16 %v1794_v25, %v1793_v29  ;;  %v3727_v34 = vpack.i.bf16 %v1874_v19, %v1873_v32  ;;  %v3732_v39 = vpack.i.bf16 %v1954_v54, %v1953_v60 }
 0x3ca   : > { %v1796_v15 = vmul.f32 %v4672_v21, %v4469_v43  ;;  %v1876_v42 = vmul.f32 %v4672_v21, %v1823_v4  ;;  %v1956_v33 = vmul.f32 %v4672_v21, %v4484_v22  ;;  %v4679_v13 = vpop.f32.mrb[17].mxu0  ;;  %v1855_v29 = vpop.permute.xlu0 %1854 }
 0x3cb   : > { %v1795_v14 = vmul.f32 %v1739_v45, %v4679_v13  ;;  %v1875_v48 = vmul.f32 %v4472_v12, %v4679_v13  ;;  %v1955_v50 = vmul.f32 %v4474_v16, %v4679_v13  ;;  %3723 = vrot.lane.b32.xlu1 %v3722_v11, %s3990_s20  ;;  %3728 = vrot.lane.b32.xlu0 %v3727_v34, %s3991_s22 }
 0x3cd   : > { %v4688_v43 = vpop.f32.mrb[18].mxu0  ;;  %v3737_v28 = vpack.i.bf16 %v1796_v15, %v1795_v14  ;;  %v3747_v22 = vpack.i.bf16 %v1956_v33, %v1955_v50  ;;  %v3742_v55 = vpack.i.bf16 %v1876_v42, %v1875_v48 }
 0x3ce   : > { %v1798_v45 = vmul.f32 %v4688_v43, %v4496_v30  ;;  %v1878_v12 = vmul.f32 %v4688_v43, %v1831_v20  ;;  %v1958_v16 = vmul.f32 %v4688_v43, %v4528_v8  ;;  %v4695_v4 = vpop.f32.mrb[19].mxu0  ;;  %v1863_v14 = vpop.permute.xlu0 %1862 }
 0x3cf   : > { %v1797_v5 = vmul.f32 %v4610_v26, %v4695_v4  ;;  %v1877_v7 = vmul.f32 %v4506_v44, %v4695_v4  ;;  %v1957_v9 = vmul.f32 %v4518_v58, %v4695_v4  ;;  %3733 = vrot.lane.b32.xlu1 %v3732_v39, %s3992_s24  ;;  %3738 = vrot.lane.b32.xlu0 %v3737_v28, %s3990_s20 }
 0x3d1   : > { %v4707_v30 = vpop.f32.mrb[20].mxu0  ;;  %v3752_v8 = vpack.i.bf16 %v1798_v45, %v1797_v5  ;;  %v3757_v10 = vpack.i.bf16 %v1878_v12, %v1877_v7  ;;  %v3762_v18 = vpack.i.bf16 %v1958_v16, %v1957_v9 }
 0x3d2   : > { %v1800_v20 = vmul.f32 %v4707_v30, %v4535_v36  ;;  %v1880_v26 = vmul.f32 %v4707_v30, %v1839_v63  ;;  %v1960_v44 = vmul.f32 %v4707_v30, %v4587_v51  ;;  %v4714_v25 = vpop.f32.mrb[21].mxu0  ;;  %v1867_v36 = vpop.permute.xlu1 %1866 }
 0x3d3   : > { %v1799_v58 = vmul.f32 %v4618_v56, %v4714_v25  ;;  %v1879_v19 = vmul.f32 %v4542_v49, %v4714_v25  ;;  %v1959_v54 = vmul.f32 %v4574_v6, %v4714_v25  ;;  %3743 = vrot.lane.b32.xlu1 %v3742_v55, %s3991_s22  ;;  %3748 = vrot.lane.b32.xlu0 %v3747_v22, %s3992_s24  ;;  %v1871_v9 = vpop.permute.xlu0 %1870 }
 0x3d5   : > { %v4724_v32 = vpop.f32.mrb[22].mxu0  ;;  %v3767_v51 = vpack.i.bf16 %v1800_v20, %v1799_v58  ;;  %v3777_v60 = vpack.i.bf16 %v1960_v44, %v1959_v54  ;;  %v3772_v63 = vpack.i.bf16 %v1880_v26, %v1879_v19 }
 0x3d6   : > { %v1802_v56 = vmul.f32 %v4724_v32, %v4606_v24  ;;  %v1882_v11 = vmul.f32 %v4724_v32, %v1847_v2  ;;  %v1962_v49 = vmul.f32 %v4724_v32, %v4620_v31  ;;  %v4731_v6 = vpop.f32.mrb[23].mxu0 }
 0x3d7   : > { %v1801_v34 = vmul.f32 %v4622_v57, %v4731_v6  ;;  %v1881_v39 = vmul.f32 %v4608_v47, %v4731_v6  ;;  %v1961_v15 = vmul.f32 %v4612_v52, %v4731_v6  ;;  %3753 = vrot.lane.b32.xlu1 %v3752_v8, %s3990_s20  ;;  %3758 = vrot.lane.b32.xlu0 %v3757_v10, %s3991_s22  ;;  %v1947_v52 = vpop.permute.xlu1 %1946 }
 0x3d9   : > { %v4741_v24 = vpop.f32.mrb[24].mxu0  ;;  %v3782_v42 = vpack.i.bf16 %v1802_v56, %v1801_v34  ;;  %v3787_v33 = vpack.i.bf16 %v1882_v11, %v1881_v39  ;;  %v3792_v31 = vpack.i.bf16 %v1962_v49, %v1961_v15 }
 0x3da   : > { %v1804_v48 = vmul.f32 %v4741_v24, %v4624_v35  ;;  %v1884_v57 = vmul.f32 %v4741_v24, %v1855_v29  ;;  %v1964_v47 = vmul.f32 %v4741_v24, %v4636_v1  ;;  %v4748_v50 = vpop.f32.mrb[25].mxu0  ;;  %v1636_v29 = vpop.permute.xlu0 %1635 }
 0x3db   : > { %v1803_v28 = vmul.f32 %v4626_v59, %v4748_v50  ;;  %v1883_v22 = vmul.f32 %v4628_v62, %v4748_v50  ;;  %v1963_v55 = vmul.f32 %v4632_v53, %v4748_v50  ;;  %3763 = vrot.lane.b32.xlu1 %v3762_v18, %s3992_s24  ;;  %3768 = vrot.lane.b32.xlu0 %v3767_v51, %s3990_s20 }
 0x3dd   : > { %v4758_v35 = vpop.f32.mrb[26].mxu0  ;;  %v3797_v2 = vpack.i.bf16 %v1804_v48, %v1803_v28  ;;  %v3807_v1 = vpack.i.bf16 %v1964_v47, %v1963_v55  ;;  %v3802_v45 = vpack.i.bf16 %v1884_v57, %v1883_v22  ;;  %v1713_v47 = vmul.f32 %v1636_v29, %v4663_v27 }
 0x3de   : > { %v1806_v12 = vmul.f32 %v4758_v35, %v4638_v3  ;;  %v1886_v59 = vmul.f32 %v4758_v35, %v1863_v14  ;;  %v1966_v62 = vmul.f32 %v4758_v35, %v4670_v38  ;;  %v4765_v16 = vpop.f32.mrb[27].mxu0  ;;  %v1951_v3 = vpop.permute.xlu1 %1950 }
 0x3df   : > { %v1805_v53 = vmul.f32 %v4630_v0, %v4765_v16  ;;  %v1885_v5 = vmul.f32 %v4646_v46, %v4765_v16  ;;  %v1965_v7 = vmul.f32 %v4654_v23, %v4765_v16  ;;  %3773 = vrot.lane.b32.xlu1 %v3772_v63, %s3991_s22  ;;  %3778 = vrot.lane.b32.xlu0 %v3777_v60, %s3992_s24  ;;  %v1651_v51 = vpop.permute.xlu0 %1650 }
 0x3e1   : > { %v4775_v8 = vpop.f32.mrb[28].mxu0  ;;  %v3812_v38 = vpack.i.bf16 %v1806_v12, %v1805_v53  ;;  %v3817_v10 = vpack.i.bf16 %v1886_v59, %v1885_v5  ;;  %v3822_v18 = vpack.i.bf16 %v1966_v62, %v1965_v7 }
 0x3e2   : > { %v1808_v0 = vmul.f32 %v4775_v8, %v4697_v41  ;;  %v1888_v20 = vmul.f32 %v4775_v8, %v1871_v9  ;;  %v1968_v46 = vmul.f32 %v4775_v8, %v1951_v3  ;;  %v4781_v26 = vpop.f32.mrb[29].mxu0 }
 0x3e3   : > { %v1807_v23 = vmul.f32 %v4634_v61, %v4781_v26  ;;  %v1887_v44 = vmul.f32 %v1867_v36, %v4781_v26  ;;  %v1967_v58 = vmul.f32 %v1947_v52, %v4781_v26  ;;  %3783 = vrot.lane.b32.xlu1 %v3782_v42, %s3990_s20  ;;  %3788 = vrot.lane.b32.xlu0 %v3787_v33, %s3991_s22  ;;  %v1641_v61 = vpop.permute.xlu1 %1640  ;;  %v1661_v63 = vpop.permute.xlu0 %1660 }
 0x3e4   : > { %v1714_v57 = vmul.f32 %v4656_v17, %v1641_v61 }
 0x3e5   : > { %v3827_v19 = vpack.i.bf16 %v1808_v0, %v1807_v23  ;;  %v3837_v54 = vpack.i.bf16 %v1968_v46, %v1967_v58  ;;  %v3832_v41 = vpack.i.bf16 %v1888_v20, %v1887_v44  ;;  %v1716_v20 = vmul.f32 %v4672_v21, %v1651_v51 }
 0x3e7   : > { %3793 = vrot.lane.b32.xlu1 %v3792_v31, %s3992_s24  ;;  %3798 = vrot.lane.b32.xlu0 %v3797_v2, %s3990_s20  ;;  %v1646_v36 = vpop.permute.xlu1 %1645  ;;  %v4801_v11 = vpop.permute.xlu0 %1665 }
 0x3e8   : > { %v1715_v46 = vmul.f32 %v1646_v36, %v4679_v13 }
 0x3eb   : > { %3803 = vrot.lane.b32.xlu1 %v3802_v45, %s3991_s22  ;;  %3808 = vrot.lane.b32.xlu0 %v3807_v1, %s3992_s24  ;;  %v1656_v60 = vpop.permute.xlu1 %1655  ;;  %v4805_v34 = vpop.permute.xlu0 %1680 }
 0x3ef   : > { %3813 = vrot.lane.b32.xlu1 %v3812_v38, %s3990_s20  ;;  %3818 = vrot.lane.b32.xlu0 %v3817_v10, %s3991_s22  ;;  %v4799_v56 = vpop.permute.xlu1 %1670  ;;  %v4809_v15 = vpop.permute.xlu0 %1685 }
 0x3f3   : > { %3823 = vrot.lane.b32.xlu1 %v3822_v18, %s3992_s24  ;;  %3828 = vrot.lane.b32.xlu0 %v3827_v19, %s3990_s20  ;;  %v4803_v49 = vpop.permute.xlu1 %1675  ;;  %v4813_v33 = vpop.permute.xlu0 %1700 }
 0x3f7   : > { %3833 = vrot.lane.b32.xlu1 %v3832_v41, %s3991_s22  ;;  %3838 = vrot.lane.b32.xlu0 %v3837_v54, %s3992_s24  ;;  %v4807_v39 = vpop.permute.xlu1 %1690  ;;  %v4817_v14 = vpop.permute.xlu0 %1705 }
 0x3fb   : > { %v4811_v42 = vpop.permute.xlu1 %1695 }
 0x3ff   : > { %v4815_v31 = vpop.permute.xlu1 %1710 }
 0x43a   : > { %v4821_v55 = vpop.f32.mrb[2].mxu1 }
 0x43b   : > { %v4823_v45 = vpop.f32.mrb[3].mxu1 }
 0x43d   : > { %v3724_v48 = vpop.permute.xlu1 %3723  ;;  %v3729_v22 = vpop.permute.xlu0 %3728 }
 0x43e   : > { %v3726_v52 = vunpack.i.h.bf16 %v3724_v48  ;;  %v3725_v28 = vunpack.i.l.bf16 %v3724_v48  ;;  %v3731_v2 = vunpack.i.h.bf16 %v3729_v22  ;;  %v3730_v1 = vunpack.i.l.bf16 %v3729_v22  ;;  %v4827_v27 = vpop.f32.mrb[4].mxu1 }
 0x43f   : > { %v4831_v10 = vpop.f32.mrb[5].mxu1 }
 0x440   : > { %v2163_v12 = vsel %vm2161_vm15, %v1714_v57, %v3726_v52  ;;  %v2162_v59 = vsel %vm2161_vm15, %v1713_v47, %v3725_v28  ;;  %v1718_v52 = vmul.f32 %v4688_v43, %v1661_v63  ;;  %v1717_v28 = vmul.f32 %v1656_v60, %v4695_v4 }
 0x441   : > { %v3734_v62 = vpop.permute.xlu1 %3733  ;;  %v3739_v5 = vpop.permute.xlu0 %3738  ;;  %v2180_v7 = vsel %vm2178_vm0, %v2163_v12, %v3731_v2  ;;  %v2179_v38 = vsel %vm2178_vm0, %v2162_v59, %v3730_v1 }
 0x442   : > { %v3736_v53 = vunpack.i.h.bf16 %v3734_v62  ;;  %v3735_v17 = vunpack.i.l.bf16 %v3734_v62  ;;  %v3741_v9 = vunpack.i.h.bf16 %v3739_v5  ;;  %v3740_v3 = vunpack.i.l.bf16 %v3739_v5  ;;  %v4837_v54 = vpop.f32.mrb[6].mxu1 }
 0x443   : > { %v4841_v57 = vpop.f32.mrb[7].mxu1 }
 0x444   : > { %v2196_v18 = vsel %vm2195_vm1, %v2179_v38, %v3735_v17  ;;  %v2197_v0 = vsel %vm2195_vm1, %v2180_v7, %v3736_v53  ;;  %v2164_v29 = vsel %vm2161_vm15, %v1715_v46, %v3740_v3  ;;  %v2165_v48 = vsel %vm2161_vm15, %v1716_v20, %v3741_v9 }
 0x445   : > { %v3744_v23 = vpop.permute.xlu1 %3743  ;;  %3353 = vmatprep.mubr.f32.mxu1 %v2196_v18  ;;  %v3749_v19 = vpop.permute.xlu0 %3748  ;;  %v1720_v46 = vmul.f32 %v4707_v30, %v4799_v56 }
 0x446   : > { %v3746_v44 = vunpack.i.h.bf16 %v3744_v23  ;;  %v3745_v58 = vunpack.i.l.bf16 %v3744_v23  ;;  %3354 = vmatmul.mubr.f32.vlgmr.msra.gmra.mrb[18].mxu1 %v2197_v0  ;;  %v3751_v41 = vunpack.i.h.bf16 %v3749_v19  ;;  %v3750_v61 = vunpack.i.l.bf16 %v3749_v19 }
 0x447   : > { %v1719_v23 = vmul.f32 %v4801_v11, %v4714_v25 }
 0x448   : > { %v2181_v21 = vsel %vm2178_vm0, %v2164_v29, %v3745_v58  ;;  %v2182_v13 = vsel %vm2178_vm0, %v2165_v48, %v3746_v44  ;;  %v4851_v17 = vpop.f32.mrb[8].mxu1 }
 0x449   : > { %v3754_v36 = vpop.permute.xlu1 %3753  ;;  %v2198_v51 = vsel %vm2195_vm1, %v2181_v21, %v3750_v61  ;;  %v2199_v47 = vsel %vm2195_vm1, %v2182_v13, %v3751_v41  ;;  %v3759_v1 = vpop.permute.xlu0 %3758 }
 0x44a   : > { %v3756_v22 = vunpack.i.h.bf16 %v3754_v36  ;;  %v3755_v2 = vunpack.i.l.bf16 %v3754_v36  ;;  %3356 = vmatprep.mubr.f32.mxu1 %v2198_v51  ;;  %v3761_v12 = vunpack.i.h.bf16 %v3759_v1  ;;  %v3760_v59 = vunpack.i.l.bf16 %v3759_v1  ;;  %v4853_v7 = vpop.f32.mrb[9].mxu1 }
 0x44b   : > { %3357 = vmatmul.mubr.f32.gmra.mrb[20].mxu1 %v2199_v47 }
 0x44c   : > { %v2166_v62 = vsel %vm2161_vm15, %v1717_v28, %v3755_v2  ;;  %v2167_v53 = vsel %vm2161_vm15, %v1718_v52, %v3756_v22  ;;  %v4859_v20 = vpop.f32.mrb[10].mxu1  ;;  %v1722_v52 = vmul.f32 %v4724_v32, %v4805_v34  ;;  %v1721_v28 = vmul.f32 %v4803_v49, %v4731_v6 }
 0x44d   : > { %v3764_v5 = vpop.permute.xlu1 %3763  ;;  %v3769_v63 = vpop.permute.xlu0 %3768  ;;  %v2183_v3 = vsel %vm2178_vm0, %v2166_v62, %v3760_v59  ;;  %v2184_v38 = vsel %vm2178_vm0, %v2167_v53, %v3761_v12 }
 0x44e   : > { %v3766_v9 = vunpack.i.h.bf16 %v3764_v5  ;;  %v3765_v43 = vunpack.i.l.bf16 %v3764_v5  ;;  %v3771_v4 = vunpack.i.h.bf16 %v3769_v63  ;;  %v3770_v60 = vunpack.i.l.bf16 %v3769_v63  ;;  %v4865_v58 = vpop.f32.mrb[11].mxu1 }
 0x450   : > { %v2200_v18 = vsel %vm2195_vm1, %v2183_v3, %v3765_v43  ;;  %v2201_v0 = vsel %vm2195_vm1, %v2184_v38, %v3766_v9  ;;  %v2168_v21 = vsel %vm2161_vm15, %v1719_v23, %v3770_v60  ;;  %v2169_v13 = vsel %vm2161_vm15, %v1720_v46, %v3771_v4  ;;  %v4871_v56 = vpop.f32.mrb[12].mxu1 }
 0x451   : > { %v3774_v44 = vpop.permute.xlu1 %3773  ;;  %3359 = vmatprep.mubr.f32.mxu1 %v2200_v18  ;;  %v3779_v61 = vpop.permute.xlu0 %3778  ;;  %v1724_v18 = vmul.f32 %v4741_v24, %v4807_v39 }
 0x452   : > { %v3776_v19 = vunpack.i.h.bf16 %v3774_v44  ;;  %v3775_v41 = vunpack.i.l.bf16 %v3774_v44  ;;  %3360 = vmatmul.mubr.f32.gmra.mrb[22].mxu1 %v2201_v0  ;;  %v3781_v29 = vunpack.i.h.bf16 %v3779_v61  ;;  %v3780_v48 = vunpack.i.l.bf16 %v3779_v61  ;;  %v4875_v47 = vpop.f32.mrb[13].mxu1 }
 0x453   : > { %v1723_v0 = vmul.f32 %v4809_v15, %v4748_v50  ;;  %v1726_v15 = vmul.f32 %v4758_v35, %v4813_v33 }
 0x454   : > { %v2185_v36 = vsel %vm2178_vm0, %v2168_v21, %v3775_v41  ;;  %v2186_v30 = vsel %vm2178_vm0, %v2169_v13, %v3776_v19  ;;  %v4883_v5 = vpop.f32.mrb[14].mxu1 }
 0x455   : > { %v3784_v25 = vpop.permute.xlu1 %3783  ;;  %v2202_v11 = vsel %vm2195_vm1, %v2185_v36, %v3780_v48  ;;  %v2203_v51 = vsel %vm2195_vm1, %v2186_v30, %v3781_v29  ;;  %v3789_v1 = vpop.permute.xlu0 %3788  ;;  %v1725_v36 = vmul.f32 %v4811_v42, %v4765_v16 }
 0x456   : > { %v3786_v22 = vunpack.i.h.bf16 %v3784_v25  ;;  %v3785_v2 = vunpack.i.l.bf16 %v3784_v25  ;;  %3362 = vmatprep.mubr.f32.mxu1 %v2202_v11  ;;  %v3791_v12 = vunpack.i.h.bf16 %v3789_v1  ;;  %v3790_v59 = vunpack.i.l.bf16 %v3789_v1  ;;  %v4885_v43 = vpop.f32.mrb[15].mxu1 }
 0x457   : > { %3363 = vmatmul.mubr.f32.gmra.mrb[24].mxu1 %v2203_v51 }
 0x458   : > { %v2170_v62 = vsel %vm2161_vm15, %v1721_v28, %v3785_v2  ;;  %v2171_v53 = vsel %vm2161_vm15, %v1722_v52, %v3786_v22 }
 0x459   : > { %v3794_v9 = vpop.permute.xlu1 %3793  ;;  %v3799_v63 = vpop.permute.xlu0 %3798  ;;  %v2187_v4 = vsel %vm2178_vm0, %v2170_v62, %v3790_v59  ;;  %v2188_v60 = vsel %vm2178_vm0, %v2171_v53, %v3791_v12 }
 0x45a   : > { %v3796_v32 = vunpack.i.h.bf16 %v3794_v9  ;;  %v3795_v34 = vunpack.i.l.bf16 %v3794_v9  ;;  %v3801_v6 = vunpack.i.h.bf16 %v3799_v63  ;;  %v3800_v49 = vunpack.i.l.bf16 %v3799_v63 }
 0x45b   : > { %v1728_v9 = vmul.f32 %v4775_v8, %v4815_v31 }
 0x45c   : > { %v2204_v3 = vsel %vm2195_vm1, %v2187_v4, %v3795_v34  ;;  %v2205_v38 = vsel %vm2195_vm1, %v2188_v60, %v3796_v32  ;;  %v2172_v29 = vsel %vm2161_vm15, %v1723_v0, %v3800_v49  ;;  %v2173_v48 = vsel %vm2161_vm15, %v1724_v18, %v3801_v6 }
 0x45d   : > { %v3804_v46 = vpop.permute.xlu1 %3803  ;;  %3365 = vmatprep.mubr.f32.mxu1 %v2204_v3  ;;  %v3809_v19 = vpop.permute.xlu0 %3808  ;;  %v1727_v32 = vmul.f32 %v4817_v14, %v4781_v26 }
 0x45e   : > { %v3806_v23 = vunpack.i.h.bf16 %v3804_v46  ;;  %v3805_v44 = vunpack.i.l.bf16 %v3804_v46  ;;  %3366 = vmatmul.mubr.f32.gmra.mrb[26].mxu1 %v2205_v38  ;;  %v3811_v41 = vunpack.i.h.bf16 %v3809_v19  ;;  %v3810_v61 = vunpack.i.l.bf16 %v3809_v19 }
 0x45f   : > { %v3993_v46 = vmov 0.0|0.0  }
 0x460   : > { %v2189_v21 = vsel %vm2178_vm0, %v2172_v29, %v3805_v44  ;;  %v2190_v13 = vsel %vm2178_vm0, %v2173_v48, %v3806_v23  ;;  %3544 = vmatprep.subr.bf16.mxu0 %v3993_v46 }
 0x461   : > { %v3814_v24 = vpop.permute.xlu1 %3813  ;;  %v2206_v39 = vsel %vm2195_vm1, %v2189_v21, %v3810_v61  ;;  %v2207_v50 = vsel %vm2195_vm1, %v2190_v13, %v3811_v41  ;;  %v3819_v11 = vpop.permute.xlu0 %3818 }
 0x462   : > { %v3816_v30 = vunpack.i.h.bf16 %v3814_v24  ;;  %v3815_v25 = vunpack.i.l.bf16 %v3814_v24  ;;  %3368 = vmatprep.mubr.f32.mxu1 %v2206_v39  ;;  %v3821_v51 = vunpack.i.h.bf16 %v3819_v11  ;;  %v3820_v52 = vunpack.i.l.bf16 %v3819_v11 }
 0x463   : > { %3369 = vmatmul.mubr.f32.gmra.mrb[28].mxu1 %v2207_v50  ;;  %v4915_v4 = vpop.f32.mrb[16].mxu1 }
 0x464   : > { %v2174_v28 = vsel %vm2161_vm15, %v1725_v36, %v3815_v25  ;;  %v2175_v22 = vsel %vm2161_vm15, %v1726_v15, %v3816_v30  ;;  %v1310_v0 = vpop.f32.mrb[17].mxu1 }
 0x465   : > { %v3824_v2 = vpop.permute.xlu1 %3823  ;;  %v3829_v59 = vpop.permute.xlu0 %3828  ;;  %v2191_v33 = vsel %vm2178_vm0, %v2174_v28, %v3820_v52  ;;  %v2192_v16 = vsel %vm2178_vm0, %v2175_v22, %v3821_v51 }
 0x466   : > { %v3826_v1 = vunpack.i.h.bf16 %v3824_v2  ;;  %v3825_v12 = vunpack.i.l.bf16 %v3824_v2  ;;  %v3831_v62 = vunpack.i.h.bf16 %v3829_v59  ;;  %v3830_v35 = vunpack.i.l.bf16 %v3829_v59 }
 0x468   : > { %v2208_v42 = vsel %vm2195_vm1, %v2191_v33, %v3825_v12  ;;  %v2209_v53 = vsel %vm2195_vm1, %v2192_v16, %v3826_v1  ;;  %v2176_v38 = vsel %vm2161_vm15, %v1727_v32, %v3830_v35  ;;  %v2177_v18 = vsel %vm2161_vm15, %v1728_v9, %v3831_v62  ;;  %v3027_v16 = vld [vmem:[%s501_s19] ss:$0 sm:$0xff]  ;;  %s4005_s19 = smov (!%p3034_p6), 96  }
 0x469   : > { %v3834_v34 = vpop.permute.xlu1 %3833  ;;  %3371 = vmatprep.mubr.f32.mxu1 %v2208_v42  ;;  %v3839_v49 = vpop.permute.xlu0 %3838 }
 0x46a   : > { %v3836_v63 = vunpack.i.h.bf16 %v3834_v34  ;;  %v3835_v6 = vunpack.i.l.bf16 %v3834_v34  ;;  %3372 = vmatmul.mubr.f32.gmra.mrb[30].mxu1 %v2209_v53  ;;  %v3841_v60 = vunpack.i.h.bf16 %v3839_v49  ;;  %v3840_v3 = vunpack.i.l.bf16 %v3839_v49 }
 0x46c   : > { %v2193_v8 = vsel %vm2178_vm0, %v2176_v38, %v3835_v6  ;;  %v2194_v31 = vsel %vm2178_vm0, %v2177_v18, %v3836_v63  ;;  %v2408_v63 = vld [vmem:[#allocation4 + $0x8] sm:$0xff] }
 0x46d   : > { %v2210_v26 = vsel %vm2195_vm1, %v2193_v8, %v3840_v3  ;;  %v2211_v14 = vsel %vm2195_vm1, %v2194_v31, %v3841_v60  ;;  %v2409_v60 = vld [vmem:[#allocation4 + $0x10] sm:$0x3]  ;;  %v3997_v8 = vmov (!%p3034_p6), 1  }
 0x46e   : > { %3374 = vmatprep.mubr.f32.mxu1 %v2210_v26  ;;  %3907 = vset.pattern.permute.xlu0 (!%p3034_p6), %v3997_v8  ;;  %v2504_v31 = vld [vmem:[%s5087_s2] sm:$0xff] (!%p3034_p6)  ;;  %v2506_v26 = vld [vmem:[%s5087_s2 + $0x10] sm:$0x3] (!%p3034_p6) }
 0x46f   : > { %3375 = vmatmul.mubr.f32.gmra.mrb[32].mxu1 %v2211_v14  ;;  %v2505_v14 = vld [vmem:[%s5087_s2 + $0x8] sm:$0xff] (!%p3034_p6)  ;;  %3930 = vrsqrt.f32 (!%p3034_p6), %v2504_v31 }
 0x470   : > { %3932 = vrsqrt.f32 (!%p3034_p6), %v2506_v26 }
 0x471   : > { %3934 = vrsqrt.f32 (!%p3034_p6), %v2505_v14 }
 0x519   : > { %v3355_v23 = vpop.f32.mrb[18].mxu1 }
 0x51a   : > { %v2374_v44 = vmul.f32 %v3355_v23, %v4821_v55  ;;  %v2294_v19 = vpop.f32.mrb[19].mxu1  ;;  %v3998_v23 = vmov (!%p3034_p6), 3  }
 0x51b   : > { %v2373_v41 = vmul.f32 %v2294_v19, %v4823_v45  ;;  %v3931_v19 = vpop.eup (!%p3034_p6), %3930 }
 0x51d   : > { %v3545_v61 = vpack.c.bf16 %v2374_v44, %v2373_v41  ;;  %v3999_v44 = vmov (!%p3034_p6), 0   ;;  %v3933_v41 = vpop.eup (!%p3034_p6), %3932 }
 0x51e   : > { %v3358_v29 = vpop.f32.mrb[20].mxu1 }
 0x51f   : > { %v2376_v48 = vmul.f32 %v3358_v29, %v4827_v27  ;;  %v2304_v21 = vpop.f32.mrb[21].mxu1  ;;  %3546 = vmatpush3.bf16.msra.mxu0 %v3545_v61  ;;  %v3935_v61 = vpop.eup (!%p3034_p6), %3934  ;;  %v2503_v29 = vld [vmem:[%s5086_s1 + $0x10] sm:$0x3] (!%p3034_p6) }
 0x520   : > { %v2375_v13 = vmul.f32 %v2304_v21, %v4831_v10  ;;  %3547 = vmatprep.subr.bf16.mxu0 %v3993_v46  ;;  %v2640_v21 = vld [vmem:[%s5096_s11 + $0x8] sm:$0xff] (!%p3034_p6) }
 0x522   : > { %v3548_v24 = vpack.c.bf16 %v2376_v48, %v2375_v13  ;;  %v2639_v48 = vld [vmem:[%s5096_s11] sm:$0xff] (!%p3034_p6)  ;;  %v2641_v13 = vld [vmem:[%s5096_s11 + $0x10] sm:$0xff] (!%p3034_p6) }
 0x524   : > { %3549 = vmatpush3.bf16.msra.mxu0 %v3548_v24  ;;  %v4000_v24 = vmov (!%p3034_p6), 0.0|0.0  }
 0x525   : > { %v3361_v39 = vpop.f32.mrb[22].mxu1  ;;  %3550 = vmatprep.subr.bf16.mxu0 %v3993_v46  ;;  %3592 = vmatprep.subr.bf16.mxu1 (!%p3034_p6), %v4000_v24 }
 0x526   : > { %v2378_v50 = vmul.f32 %v3361_v39, %v4837_v54  ;;  %v2314_v15 = vpop.f32.mrb[23].mxu1  ;;  %v3569_v39 = vpack.c.bf16 (!%p3034_p6), %v2640_v21, %v2639_v48 }
 0x527   : > { %v2377_v55 = vmul.f32 %v2314_v15, %v4841_v57 }
 0x529   : > { %v3551_v36 = vpack.c.bf16 %v2378_v50, %v2377_v55  ;;  %v2642_v50 = vld [vmem:[%s5096_s11 + $0x18] sm:$0xff] (!%p3034_p6)  ;;  %v2643_v55 = vld [vmem:[%s5096_s11 + $0x20] sm:$0xff] (!%p3034_p6) }
 0x52a   : > { %v3364_v45 = vpop.f32.mrb[24].mxu1  ;;  %v3572_v15 = vpack.c.bf16 (!%p3034_p6), %v2642_v50, %v2641_v13 }
 0x52b   : > { %v2380_v30 = vmul.f32 %v3364_v45, %v4851_v17  ;;  %v2324_v25 = vpop.f32.mrb[25].mxu1  ;;  %3552 = vmatpush3.bf16.msra.mxu0 %v3551_v36  ;;  %v2644_v36 = vld [vmem:[%s5096_s11 + $0x28] sm:$0xff] (!%p3034_p6) }
 0x52c   : > { %v2379_v27 = vmul.f32 %v2324_v25, %v4853_v7  ;;  %3553 = vmatprep.subr.bf16.mxu0 %v3993_v46  ;;  %v3575_v45 = vpack.c.bf16 (!%p3034_p6), %v2644_v36, %v2643_v55  ;;  %v2646_v25 = vld [vmem:[%s5096_s11 + $0x38] sm:$0xff] (!%p3034_p6) }
 0x52e   : > { %v3554_v10 = vpack.c.bf16 %v2380_v30, %v2379_v27  ;;  %v2645_v30 = vld [vmem:[%s5096_s11 + $0x30] sm:$0xff] (!%p3034_p6) }
 0x52f   : > { %v3578_v27 = vpack.c.bf16 (!%p3034_p6), %v2646_v25, %v2645_v30 }
 0x530   : > { %3555 = vmatpush3.bf16.msra.mxu0 %v3554_v10  ;;  %v2647_v10 = vld [vmem:[%s5096_s11 + $0x40] sm:$0xff] (!%p3034_p6) }
 0x531   : > { %v3367_v11 = vpop.f32.mrb[26].mxu1  ;;  %3556 = vmatprep.subr.bf16.mxu0 %v3993_v46 }
 0x532   : > { %v2382_v51 = vmul.f32 %v3367_v11, %v4859_v20  ;;  %v2334_v52 = vpop.f32.mrb[27].mxu1  ;;  %v2648_v11 = vld [vmem:[%s5096_s11 + $0x48] sm:$0xff] (!%p3034_p6) }
 0x533   : > { %v2381_v54 = vmul.f32 %v2334_v52, %v4865_v58  ;;  %v2649_v52 = vld [vmem:[%s5096_s11 + $0x50] sm:$0xff] (!%p3034_p6) }
 0x535   : > { %v3557_v28 = vpack.c.bf16 %v2382_v51, %v2381_v54  ;;  %v3581_v51 = vpack.c.bf16 (!%p3034_p6), %v2648_v11, %v2647_v10  ;;  %v2650_v54 = vld [vmem:[%s5096_s11 + $0x58] sm:$0xff] (!%p3034_p6) }
 0x536   : > { %v3370_v57 = vpop.f32.mrb[28].mxu1 }
 0x537   : > { %v2384_v22 = vmul.f32 %v3370_v57, %v4871_v56  ;;  %v2344_v2 = vpop.f32.mrb[29].mxu1  ;;  %3558 = vmatpush3.bf16.msra.mxu0 %v3557_v28  ;;  %v3584_v28 = vpack.c.bf16 (!%p3034_p6), %v2650_v54, %v2649_v52  ;;  %v2651_v57 = vld [vmem:[%s5096_s11 + $0x60] sm:$0xff] (!%p3034_p6) }
 0x538   : > { %v2383_v17 = vmul.f32 %v2344_v2, %v4875_v47  ;;  %3559 = vmatprep.subr.bf16.mxu0 %v3993_v46  ;;  %v2390_v47 = vshrl.u32 %v1319_v37, 7  ;;  %v2407_v37 = vld [vmem:[#allocation4] sm:$0xff]  ;;  %v2754_v54 = vld [vmem:[%s5098_s13] sm:$0xff] (!%p3034_p6) }
 0x53a   : > { %v3560_v7 = vpack.c.bf16 %v2384_v22, %v2383_v17  ;;  %vm2398_vm3 = vcmp.eq.s32.totalorder %v3027_v16, %v2390_v47  ;;  %v2392_v53 = vadd.s32 16, %v2390_v47  ;;  %v2652_v22 = vld [vmem:[%s5096_s11 + $0x68] sm:$0xff] (!%p3034_p6) }
 0x53b   : > { %v3587_v2 = vpack.c.bf16 (!%p3034_p6), %v2652_v22, %v2651_v57  ;;  %v2756_v22 = vld [vmem:[%s5098_s13 + $0x10] sm:$0x3] (!%p3034_p6) }
 0x53c   : > { %3561 = vmatpush3.bf16.msra.mxu0 %v3560_v7  ;;  %vm2400_vm5 = vcmp.eq.s32.totalorder %v3027_v16, %v2392_v53 }
 0x53d   : > { %v3373_v1 = vpop.f32.mrb[30].mxu1  ;;  %3562 = vmatprep.subr.bf16.mxu0 %v3993_v46 }
 0x53e   : > { %v2386_v12 = vmul.f32 %v3373_v1, %v4883_v5  ;;  %v2354_v20 = vpop.f32.mrb[31].mxu1  ;;  %v2391_v5 = vadd.s32 8, %v2390_v47 }
 0x53f   : > { %v2385_v59 = vmul.f32 %v2354_v20, %v4885_v43  ;;  %v3995_v43 = vmov 1.0   ;;  %v2653_v20 = vld [vmem:[%s5096_s11 + $0x70] sm:$0xff] (!%p3034_p6) }
 0x540   : > { %vm2399_vm4 = vcmp.eq.s32.totalorder %v3027_v16, %v2391_v5  ;;  %v4002_v16 = vmov (!%p3034_p6), 0.0  }
 0x541   : > { %v3563_v58 = vpack.c.bf16 %v2386_v12, %v2385_v59  ;;  %v2654_v59 = vld [vmem:[%s5096_s11 + $0x78] sm:$0xff] (!%p3034_p6)  ;;  %3465 = vmatprep.mubr.msk.f32.mxu1 (!%p3034_p6), %vm4001_vm8, %v4002_v16 }
 0x542   : > { %v3376_v62 = vpop.f32.mrb[32].mxu1 }
 0x543   : > { %v2388_v35 = vmul.f32 %v3376_v62, %v4915_v4  ;;  %v2364_v56 = vpop.f32.mrb[33].mxu1  ;;  %3564 = vmatpush3.bf16.msra.mxu0 %v3563_v58  ;;  %v3590_v62 = vpack.c.bf16 (!%p3034_p6), %v2654_v59, %v2653_v20 }
 0x544   : > { %v2387_v33 = vmul.f32 %v2364_v56, %v1310_v0  ;;  %3565 = vmatprep.subr.bf16.mxu0 %v3993_v46  ;;  %v3996_v0 = vmov (!%p3034_p6), 2   ;;  %v2502_v46 = vld [vmem:[%s5086_s1 + $0x8] sm:$0xff] (!%p3034_p6) }
 0x545   : > { %3908 = vset.pattern.permute.xlu1 (!%p3034_p6), %v3996_v0 }
 0x546   : > { %v3566_v42 = vpack.c.bf16 %v2388_v35, %v2387_v33 }
 0x548   : > { %3567 = vmatpush3.bf16.msra.mxu0 %v3566_v42 }
 0x549   : > { %3568 = vmatprep.subr.bf16.mxu0 (!%p3034_p6), %v4000_v24 }
 0x54b   : > { %3410 = vmatmul.mubr.msk.f32.vlgmr.msra.gmra.mrb[30].mxu0 %vm2398_vm3, %v3995_v43 }
 0x54c   : > { %3412 = vmatprep.mubr.msk.f32.mxu0 %vm3994_vm2, %v3989_v40  ;;  %3570 = vmatpush3.bf16.msra.mxu0 (!%p3034_p6), %v3569_v39 }
 0x54d   : > { %3571 = vmatprep.subr.bf16.mxu0 (!%p3034_p6), %v4000_v24 }
 0x54f   : > { %3413 = vmatmul.mubr.msk.f32.gmra.mrb[32].mxu0 %vm2399_vm4, %v3995_v43 }
 0x550   : > { %3415 = vmatprep.mubr.msk.f32.mxu0 %vm3994_vm2, %v3989_v40  ;;  %v2501_v40 = vld [vmem:[%s5086_s1] sm:$0xff] (!%p3034_p6)  ;;  %3573 = vmatpush3.bf16.msra.mxu0 (!%p3034_p6), %v3572_v15 }
 0x551   : > { %2565 = vperm.xlu1 (!%p3034_p6), %3908, %v2501_v40   ;;  %2550 = vperm.xlu0 (!%p3034_p6), %3907, %v2501_v40  }
 0x552   : > { %3574 = vmatprep.subr.bf16.mxu0 (!%p3034_p6), %v4000_v24 }
 0x553   : > { %3416 = vmatmul.mubr.msk.f32.gmra.mrb[34].mxu0 %vm2400_vm5, %v3995_v43 }
 0x554   : > { %3576 = vmatpush3.bf16.msra.mxu0 (!%p3034_p6), %v3575_v45  ;;  %3450 = vmatprep.mubr.msk.f32.mxu0 (!%p3034_p6), %vm4001_vm8, %v4002_v16 }
 0x555   : > { %3909 = vset.pattern.permute.xlu1 (!%p3034_p6), %v3998_v23  ;;  %2554 = vperm.xlu0 (!%p3034_p6), %3907, %v2502_v46  }
 0x556   : > { %2580 = vperm.xlu1 (!%p3034_p6), %3909, %v2501_v40   ;;  %3577 = vmatprep.subr.bf16.mxu0 (!%p3034_p6), %v4000_v24 }
 0x558   : > { %3579 = vmatpush3.bf16.msra.mxu0 (!%p3034_p6), %v3578_v27 }
 0x559   : > { %3911 = vset.pattern.permute.xlu0 (!%p3034_p6), %v3999_v44  ;;  %3580 = vmatprep.subr.bf16.mxu0 (!%p3034_p6), %v4000_v24 }
 0x55a   : > { %3910 = vset.pattern.permute.xlu1 (!%p3034_p6), %v3996_v0  ;;  %2515 = vperm.xlu0 (!%p3034_p6), %3911, %v3931_v19  }
 0x55b   : > { %2569 = vperm.xlu1 (!%p3034_p6), %3910, %v2502_v46  }
 0x55c   : > { %3582 = vmatpush3.bf16.msra.mxu0 (!%p3034_p6), %v3581_v51 }
 0x55d   : > { %3583 = vmatprep.subr.bf16.mxu0 (!%p3034_p6), %v4000_v24 }
 0x55e   : > { %2525 = vperm.xlu0 (!%p3034_p6), %3911, %v3933_v41  }
 0x55f   : > { %3912 = vset.pattern.permute.xlu1 (!%p3034_p6), %v3999_v44 }
 0x560   : > { %2520 = vperm.xlu1 (!%p3034_p6), %3912, %v3935_v61   ;;  %3585 = vmatpush3.bf16.msra.mxu0 (!%p3034_p6), %v3584_v28  ;;  %v2755_v28 = vld [vmem:[%s5098_s13 + $0x8] sm:$0xff] (!%p3034_p6) }
 0x561   : > { %3586 = vmatprep.subr.bf16.mxu0 (!%p3034_p6), %v4000_v24  ;;  %v3593_v57 = vpack.c.bf16 (!%p3034_p6), %v2755_v28, %v2754_v54 }
 0x562   : > { %3915 = vset.pattern.permute.xlu0 (!%p3034_p6), %v3996_v0 }
 0x563   : > { %2573 = vperm.xlu0 (!%p3034_p6), %3915, %v2503_v29   ;;  %3594 = vmatpush3.bf16.msra.mxu1 (!%p3034_p6), %v3593_v57 }
 0x564   : > { %3913 = vset.pattern.permute.xlu1 (!%p3034_p6), %v3998_v23  ;;  %3588 = vmatpush3.bf16.msra.mxu0 (!%p3034_p6), %v3587_v2  ;;  %v2735_v2 = vld [vmem:[#allocation3] sm:$0xff] (!%p3034_p6) }
 0x565   : > { %2584 = vperm.xlu1 (!%p3034_p6), %3913, %v2502_v46   ;;  %3589 = vmatprep.subr.bf16.mxu0 (!%p3034_p6), %v4000_v24 }
 0x566   : > { %3463 = vmatprep.subr.mxu1 (!%p3034_p6), %v4002_v16 }
 0x567   : > { %3918 = vset.pattern.permute.xlu0 (!%p3034_p6), %v3999_v44  ;;  %3464 = vmatpush3.msk.msra.mxu1 (!%p3034_p6), %vm862_vm7, %v2756_v22  ;;  %vm2851_vm7 = vcmask (!%p3034_p6), 140288  }
 0x568   : > { %2538 = vperm.xlu0 (!%p3034_p6), %3918, %v2502_v46   ;;  %3591 = vmatpush3.bf16.msra.mxu0 (!%p3034_p6), %v3590_v62 }
 0x569   : > { %3914 = vset.pattern.permute.xlu1 (!%p3034_p6), %v3997_v8 }
 0x56a   : > { %2558 = vperm.xlu1 (!%p3034_p6), %3914, %v2503_v29  }
 0x56c   : > { %3929 = vset.pattern.permute.xlu0 (!%p3034_p6), %v3998_v23 }
 0x56e   : > { %3916 = vset.pattern.permute.xlu1 (!%p3034_p6), %v3998_v23 }
 0x56f   : > { %2588 = vperm.xlu1 (!%p3034_p6), %3916, %v2503_v29  }
 0x573   : > { %3917 = vset.pattern.permute.xlu1 (!%p3034_p6), %v3999_v44 }
 0x574   : > { %2533 = vperm.xlu1 (!%p3034_p6), %3917, %v2501_v40  }
 0x578   : > { %2543 = vperm.xlu1 (!%p3034_p6), %3917, %v2503_v29  }
 0x5d0   : > { %v2566_v17 = vpop.permute.xlu1 (!%p3034_p6), %2565  ;;  %v2551_v7 = vpop.permute.xlu0 (!%p3034_p6), %2550 }
 0x5d4   : > { %v2555_v12 = vpop.permute.xlu0 (!%p3034_p6), %2554 }
 0x5d5   : > { %v2581_v1 = vpop.permute.xlu1 (!%p3034_p6), %2580 }
 0x5d9   : > { %v2516_v56 = vpop.permute.xlu0 (!%p3034_p6), %2515 }
 0x5da   : > { %v2570_v58 = vpop.permute.xlu1 (!%p3034_p6), %2569 }
 0x5df   : > { %v2521_v42 = vpop.permute.xlu1 (!%p3034_p6), %2520 }
 0x61e   : > { %v2476_v9 = vpop.f32.mrb[30].mxu0 }
 0x61f   : > { %v2490_v32 = vadd.f32 %v2476_v9, %v2407_v37  ;;  %v3411_v34 = vpop.f32.mrb[31].mxu0 }
 0x620   : > { %v2585_v34 = vpop.permute.xlu1 (!%p3034_p6), %2584 }
 0x621   : > { %2493 = vst.msk [vmem:[#allocation4] sm:$0xff] %vm2161_vm15, %v2490_v32  ;;  %v2526_v32 = vpop.permute.xlu0 (!%p3034_p6), %2525 }
 0x622   : > { %v2481_v6 = vpop.f32.mrb[32].mxu0 }
 0x623   : > { %v2491_v49 = vadd.f32 %v2481_v6, %v2408_v63  ;;  %v3414_v4 = vpop.f32.mrb[33].mxu0  ;;  %2500 = sbr.rel (%p3034_p6) target bundleno = 2144 (0x860), region = 84 }
 0x625   : > { %2494 = vst.msk [vmem:[#allocation4 + $0x8] sm:$0xff] %vm2161_vm15, %v2491_v49 }
 0x626   : > { %v2486_v3 = vpop.f32.mrb[34].mxu0 }
 0x627   : > { %v2492_v38 = vadd.f32 %v2486_v3, %v2409_v60  ;;  %v3417_v18 = vpop.f32.mrb[35].mxu0  ;;  %v2574_v3 = vpop.permute.xlu0 (!%p3034_p6), %2573 }
 0x628   : > { %v2510_v35 = vld [vmem:[#allocation4] sm:$0xff] (!%p3034_p6) }
 0x629   : > { %2496 = vst.msk [vmem:[#allocation4 + $0x10] sm:$0x3] %vm2495_vm6, %v2492_v38  ;;  %v2528_v47 = vmul.f32 (!%p3034_p6), %v2516_v56, %v2510_v35  ;;  %v2559_v38 = vpop.permute.xlu1 (!%p3034_p6), %2558  ;;  %v2737_v56 = vld [vmem:[#allocation3 + $0x10] sm:$0x3] (!%p3034_p6) }
 0x62b   : > { %v2576_v43 = vmul.f32 %v2566_v17, %v2528_v47  ;;  %v2561_v37 = vmul.f32 %v2551_v7, %v2528_v47  ;;  %v2591_v60 = vmul.f32 %v2581_v1, %v2528_v47  ;;  %v2539_v14 = vpop.permute.xlu0 %2538  ;;  %v3035_v17 = vld [vmem:[%s5097_s12] ss:$0 sm:$0xff]  ;;  %v2738_v7 = vmul.f32 0.38268343, %v2735_v2 }
 0x62c   : > { %v2511_v33 = vld [vmem:[#allocation4 + $0x8] sm:$0xff] }
 0x62d   : > { %v2529_v5 = vmul.f32 %v2521_v42, %v2511_v33  ;;  %v2589_v8 = vpop.permute.xlu1 %2588 }
 0x62f   : > { %v2577_v53 = vmul.f32 %v2570_v58, %v2529_v5  ;;  %v2562_v9 = vmul.f32 %v2555_v12, %v2529_v5  ;;  %v2592_v4 = vmul.f32 %v2585_v34, %v2529_v5  ;;  %v2547_v23 = vmul.f32 %v2539_v14, %v2529_v5  ;;  %v2736_v12 = vld [vmem:[#allocation3 + $0x8] sm:$0xff] }
 0x630   : > { %v2512_v49 = vld [vmem:[#allocation4 + $0x10] sm:$0x3]  ;;  %v2739_v62 = vmul.f32 0.38268343, %v2736_v12  ;;  %v2740_v5 = vmul.f32 0.38268343, %v2737_v56 }
 0x631   : > { %v3924_v63 = vpack.i.bf16 %v2577_v53, %v2576_v43  ;;  %v3919_v6 = vpack.i.bf16 %v2562_v9, %v2561_v37  ;;  %v2530_v18 = vmul.f32 %v2526_v32, %v2512_v49  ;;  %v2534_v26 = vpop.permute.xlu1 %2533 }
 0x632   : > { %v2546_v41 = vmul.f32 %v2534_v26, %v2528_v47 }
 0x633   : > { %3925 = vrot.lane.b32.xlu0 %v3924_v63, %s4003_s23  ;;  %3920 = vrot.lane.b32.xlu1 %v3919_v6, %s4004_s16  ;;  %v2578_v40 = vmul.f32 %v2574_v3, %v2530_v18  ;;  %v2563_v0 = vmul.f32 %v2559_v38, %v2530_v18  ;;  %v2593_v31 = vmul.f32 %v2589_v8, %v2530_v18 }
 0x635   : > { %v2544_v46 = vpop.permute.xlu1 %2543 }
 0x636   : > { %v2548_v45 = vmul.f32 %v2544_v46, %v2530_v18 }
 0x637   : > { %2623 = vrot.lane.b32.xlu0 %v2592_v4, %s4005_s19  ;;  %2621 = vrot.lane.b32.xlu1 %v2591_v60, %s4005_s19 }
 0x63b   : > { %2601 = vrot.lane.b32.xlu1 %v2563_v0, %s4004_s16  ;;  %2613 = vrot.lane.b32.xlu0 %v2578_v40, %s4003_s23 }
 0x63f   : > { %2625 = vrot.lane.b32.xlu1 %v2593_v31, %s4005_s19 }
 0x6a5   : > { %v3921_v44 = vpop.permute.xlu1 %3920  ;;  %v3926_v19 = vpop.permute.xlu0 %3925 }
 0x6a6   : > { %v3923_v61 = vunpack.i.h.bf16 %v3921_v44  ;;  %v3922_v29 = vunpack.i.l.bf16 %v3921_v44  ;;  %v3927_v48 = vunpack.i.l.bf16 %v3926_v19  ;;  %v3928_v21 = vunpack.i.h.bf16 %v3926_v19 }
 0x6a8   : > { %v2630_v13 = vsel %vm2161_vm15, %v2546_v41, %v3922_v29  ;;  %v2631_v24 = vsel %vm2161_vm15, %v2547_v23, %v3923_v61 }
 0x6a9   : > { %v2622_v39 = vpop.permute.xlu1 %2621  ;;  %v2633_v50 = vsel %vm2178_vm0, %v2630_v13, %v3927_v48  ;;  %v2624_v15 = vpop.permute.xlu0 %2623  ;;  %v2634_v36 = vsel %vm2178_vm0, %v2631_v24, %v3928_v21 }
 0x6aa   : > { %v2636_v55 = vsel %vm2195_vm1, %v2633_v50, %v2622_v39  ;;  %v2637_v25 = vsel %vm2195_vm1, %v2634_v36, %v2624_v15 }
 0x6ab   : > { %3451 = vmatmul.mubr.f32.vlgmr.msra.gmra.mrb[0].mxu0 %v2636_v55 }
 0x6ac   : > { %3453 = vmatprep.mubr.msk.f32.mxu0 %vm4001_vm8, %v4002_v16 }
 0x6ad   : > { %v2602_v30 = vpop.permute.xlu1 %2601  ;;  %v2614_v10 = vpop.permute.xlu0 %2613 }
 0x6ae   : > { %v2632_v27 = vsel %vm2161_vm15, %v2548_v45, %v2602_v30 }
 0x6af   : > { %3454 = vmatmul.mubr.f32.gmra.mrb[2].mxu0 %v2637_v25  ;;  %v2635_v11 = vsel %vm2178_vm0, %v2632_v27, %v2614_v10 }
 0x6b0   : > { %3456 = vmatprep.mubr.msk.f32.mxu0 %vm4001_vm8, %v4002_v16 }
 0x6b1   : > { %v2626_v51 = vpop.permute.xlu1 %2625 }
 0x6b2   : > { %v2638_v52 = vsel %vm2195_vm1, %v2635_v11, %v2626_v51 }
 0x6b3   : > { %3457 = vmatmul.mubr.f32.gmra.mrb[4].mxu0 %v2638_v52 }
 0x77e   : > { %v2721_v1 = vpop.f32.mrb[0].mxu0 }
 0x77f   : > { %v2748_v20 = vmul.f32 %v3035_v17, %v2721_v1  ;;  %v3452_v59 = vpop.f32.mrb[1].mxu0 }
 0x781   : > { %v2751_v58 = vadd.f32 %v2748_v20, %v2738_v7 }
 0x782   : > { %v2726_v35 = vpop.f32.mrb[2].mxu0 }
 0x783   : > { %v2749_v33 = vmul.f32 %v3035_v17, %v2726_v35  ;;  %v3455_v47 = vpop.f32.mrb[3].mxu0  ;;  %3466 = vmatmul.mubr.msk.f32.vlgmr.msra.gmra.mrb[0].mxu1 %vm1436_vm11, %v2751_v58 }
 0x784   : > { %3468 = vmatprep.mubr.msk.f32.mxu1 %vm4001_vm8, %v4002_v16 }
 0x785   : > { %v2752_v42 = vadd.f32 %v2749_v33, %v2739_v62 }
 0x786   : > { %v2731_v43 = vpop.f32.mrb[4].mxu0 }
 0x787   : > { %v2750_v53 = vmul.f32 %v3035_v17, %v2731_v43  ;;  %v3458_v37 = vpop.f32.mrb[5].mxu0  ;;  %3469 = vmatmul.mubr.msk.f32.gmra.mrb[2].mxu1 %vm1436_vm11, %v2752_v42 }
 0x788   : > { %3471 = vmatprep.mubr.msk.f32.mxu1 %vm4001_vm8, %v4002_v16 }
 0x789   : > { %v2753_v9 = vadd.f32 %v2750_v53, %v2740_v5 }
 0x78b   : > { %3472 = vmatmul.mubr.msk.f32.gmra.mrb[4].mxu1 %vm1436_vm11, %v2753_v9 }
 0x856   : > { %v2835_v32 = vpop.f32.mrb[0].mxu1 }
 0x857   : > { %2849 = vst.msk [vmem:[#allocation5] sm:$0xff] %vm1436_vm11, %v2835_v32  ;;  %v3467_v34 = vpop.f32.mrb[1].mxu1 }
 0x85a   : > { %v2840_v63 = vpop.f32.mrb[2].mxu1 }
 0x85b   : > { %2850 = vst.msk [vmem:[#allocation5 + $0x8] sm:$0xff] %vm1436_vm11, %v2840_v63  ;;  %v3470_v6 = vpop.f32.mrb[3].mxu1 }
 0x85e   : > { %v2845_v49 = vpop.f32.mrb[4].mxu1 }
 0x85f   : > { %2852 = vst.msk [vmem:[#allocation5 + $0x10] sm:$0x3] %vm2851_vm7, %v2845_v49  ;;  %v3473_v4 = vpop.f32.mrb[5].mxu1 }
 0x860 PF: > { %p3617_p7 = scmp.eq.s32.totalorder %s4090_s30, 2  ;;  %s4006_s20 = smov [#allocation5]  }
 0x861   : > { %s2859_s22 = sshll.u32 %s4006_s20, 4  ;;  %s2860_s22 = int_to_ptr.vmem [resolvable:$true] %s2859_s22 }
 0x862   : > { %s3936_s24 = scalar_lea.vmem %s2860_s22, 384  ;;  %p3943_p11 = scmp.lt.s32.totalorder %s2860_s22, %s2860_s22 }
 0x863   : > { %p3937_p8 = scmp.ne.s32.totalorder %s2860_s22, %s3936_s24  ;;  %p3944_p12 = scmp.lt.s32.totalorder %s3936_s24, %s3936_s24 }
 0x865   : > { %p3938_p9 = pnand %p3937_p8, %p3617_p7  ;;  %p3945_p13 = por %p3944_p12, %p3943_p11 }
 0x867   : > { %p3939_p10 = pneg %p3938_p9 }
 0x869   : > { %p3946_p0 = pnand %p3945_p13, %p3939_p10 }
 0x86b   : > { %3949 = shalt.err (!%p3946_p0)
}
 0x86c   : > { %s3950_s16 = scalar_lea.hbm %s5099_s14, 384 }
 0x86d   : > { %p3951_p1 = scmp.ne.s32.totalorder %s5099_s14, %s3950_s16  ;;  %p3956_p4 = scmp.lt.u32.totalorder %s3950_s16, %s5099_s14 }
 0x86f   : > { %p3952_p2 = pnand %p3951_p1, %p3617_p7 }
 0x871   : > { %p3953_p3 = pneg %p3952_p2 }
 0x873   : > { %p3958_p5 = pnand %p3956_p4, %p3953_p3 }
 0x875   : > { %3961 = shalt.err (!%p3958_p5)
}
 0x876   : > { %s4007_s28 = smov 128   ;;  %s4008_s17 = smov 8  }
 0x877   : > { %3614 = dma.vmem_to_hbm [thread:$0]  (%p3617_p7), %s2860_s22, 384, %s5099_s14, [#allocation6], %s4007_s28, %s4007_s28, %s4008_s17  }
 0x878   : > { %3967 = dma.done.wait (%p3617_p7), [#allocation6], 384  }
 0x879   : > { %3969 = vsyncadd (%p3617_p7), [#allocation6], 4294966912 }
 0x87a PF: > { %s5102_s21 = sld [smem:[#allocation8_spill]] }
 0x880   : > { %s25_s29 = sadd.s32 1, %s5102_s21  }
 0x881   : > { %p22_p6 = scmp.ge.s32.totalorder %s25_s29, 5  }
 0x883   :  { %24 = sbr.rel (!%p22_p6) target bundleno = 1 (0x1), region = 120 }
 0x88a   :  { %2875 = vsyncpa [#allocation6], 1 }
 0x88b   :  { %2877 = vsyncpa [#allocation6 + $0x1], 1 }

</bundles_post_ra>
